<compile_context>
chip_gen: v6e
topology: v6e:2x2x1
jax: 0.10.0
libtpu: 0.0.40
codegen_flags: <defaults>
</compile_context>

<pallas_src>
import math
import jax
import jax.numpy as jnp
from jax.experimental import pallas as pl
from jax.experimental.pallas import tpu as pltpu

# ----- small config consistent with the module -----
B = 2             # batch
S = 16            # seq_len (<= max_len)
D = 128           # d_model
H = 4             # num_heads
DH = D // H       # head dim
EXPANSION = 1     # expansion_factor
DHID = D * EXPANSION
BS = B * S
EPS = 1e-5        # nn.LayerNorm default
NEG_INF = -1e30   # large finite negative for masking (avoids inf-inf -> NaN)
LN2 = math.log(2.0)


def get_alibi_slopes(num_heads):
    x = (2 ** 8) ** (1 / num_heads)
    return [1.0 / x ** (i + 1) for i in range(num_heads)]


def _layernorm(x, gamma, beta):
    mu = jnp.mean(x, axis=-1, keepdims=True)
    var = jnp.mean((x - mu) ** 2, axis=-1, keepdims=True)
    return (x - mu) * jax.lax.rsqrt(var + EPS) * gamma + beta


def alibi_layer_kernel(x_ref, g_attn_ref, b_attn_ref, wkqv_ref,
                       g_ffn_ref, b_ffn_ref, w1_ref, b1_ref, w2_ref, b2_ref,
                       o_ref):
    x = x_ref[...]                                               # (BS, D) f32

    # ---------------- attention branch (pre-LN) ----------------
    xn = _layernorm(x, g_attn_ref[...], b_attn_ref[...])

    # Single flat KQV projection: (BS, D) bf16 @ (D, 3D) bf16 -> (BS, 3D) f32.
    kqv = jnp.dot(xn.astype(jnp.bfloat16), wkqv_ref[...],
                  preferred_element_type=jnp.float32)            # (BS, 3D)
    k2 = kqv[:, 0:D]
    q2 = kqv[:, D:2 * D] * (1.0 / math.sqrt(D))   # fold 1/sqrt(d_model) into q
    v2 = kqv[:, 2 * D:3 * D]

    # Head-major stacks via static DH=32 lane slices; bf16 for the MXU.
    k_h = jnp.stack([k2[:, h * DH:(h + 1) * DH] for h in range(H)],
                    axis=0).astype(jnp.bfloat16)                 # (H, BS, DH)
    q_h = jnp.stack([q2[:, h * DH:(h + 1) * DH] for h in range(H)],
                    axis=0).astype(jnp.bfloat16)
    v_h = jnp.stack([v2[:, h * DH:(h + 1) * DH] for h in range(H)],
                    axis=0).astype(jnp.bfloat16)

    # Scores: bf16 operands, f32 accumulation.
    scores = jnp.einsum('hqd,hkd->hqk', q_h, k_h,
                        preferred_element_type=jnp.float32)      # (H, BS, BS)

    # In-kernel fused ALiBi + causal + batch-block additive bias.
    iq = jax.lax.broadcasted_iota(jnp.int32, (H, BS, BS), 1)     # query idx
    ik = jax.lax.broadcasted_iota(jnp.int32, (H, BS, BS), 2)     # key idx
    ih = jax.lax.broadcasted_iota(jnp.int32, (H, BS, BS), 0)     # head idx
    fq = iq.astype(jnp.float32)
    fk = ik.astype(jnp.float32)
    fh = ih.astype(jnp.float32)
    same_batch = (jnp.floor(fq * (1.0 / S)) == jnp.floor(fk * (1.0 / S)))
    causal = ik <= iq
    # slope_h = 2^{-8(h+1)/H}  (matches get_alibi_slope)
    slopes = jnp.exp((fh + 1.0) * (-8.0 * LN2 / H))
    bias = jnp.where(same_batch & causal, slopes * (fk - fq), NEG_INF)

    scores = scores + bias
    scores = scores - jnp.max(scores, axis=-1, keepdims=True)
    p = jnp.exp(scores)
    denom = jnp.sum(p, axis=-1, keepdims=True)
    p = p * pl.reciprocal(denom, approx=True)                    # EUP reciprocal

    # Context: bf16 operands, output directly in (q, h, d) order -> single
    # reshape to (BS, D) instead of a per-head lane concat.
    ctx = jnp.einsum('hqk,hkd->qhd', p.astype(jnp.bfloat16), v_h,
                     preferred_element_type=jnp.float32)         # (BS, H, DH)
    attn_out = ctx.reshape(BS, D)
    # dropout -> identity
    x1 = x + attn_out

    # ---------------- feed-forward branch (pre-LN) ----------------
    x1n = _layernorm(x1, g_ffn_ref[...], b_ffn_ref[...])
    h1 = jnp.dot(x1n.astype(jnp.bfloat16), w1_ref[...],
                 preferred_element_type=jnp.float32) + b1_ref[...]
    h1 = jax.nn.gelu(h1, approximate=True)   # tanh GELU (EUP path); ~1e-3 err
    h2 = jnp.dot(h1.astype(jnp.bfloat16), w2_ref[...],
                 preferred_element_type=jnp.float32) + b2_ref[...]
    # dropout -> identity
    o_ref[...] = x1 + h2


def prepare_params(params):
    """One-time weight preprocessing (hoisted out of the per-forward path):
    bf16 casts of the matmul weights; biases / LN params stay f32."""
    g_a, b_a, wkqv, g_f, b_f, w1, b1, w2, b2 = params
    return (g_a, b_a, wkqv.astype(jnp.bfloat16), g_f, b_f,
            w1.astype(jnp.bfloat16), b1, w2.astype(jnp.bfloat16), b2)


def alibi_transformer_layer(x, prepared_params):
    """x: (B, S, D) float32; prepared_params from prepare_params()."""
    g_a, b_a, wkqv_b, g_f, b_f, w1_b, b1, w2_b, b2 = prepared_params

    x2 = x.reshape(BS, D)

    def full(shape):
        return pl.BlockSpec(shape, lambda i: (0,) * len(shape))

    out2 = pl.pallas_call(
        alibi_layer_kernel,
        out_shape=jax.ShapeDtypeStruct((BS, D), jnp.float32),
        grid=(1,),   # fully fused: one invocation, M = B*S rows on the MXU
        in_specs=[
            full((BS, D)),            # x (batch*seq flattened)
            full((1, D)),             # attn_norm gamma
            full((1, D)),             # attn_norm beta
            full((D, 3 * D)),         # flat kqv weight (bf16)
            full((1, D)),             # ffn_norm gamma
            full((1, D)),             # ffn_norm beta
            full((D, DHID)),          # fc1 weight (bf16)
            full((1, DHID)),          # fc1 bias
            full((DHID, D)),          # fc2 weight (bf16)
            full((1, D)),             # fc2 bias
        ],
        out_specs=full((BS, D)),
        compiler_params=pltpu.CompilerParams(
            dimension_semantics=("arbitrary",)),
        # TODO(synk): at realistic B*S sizes add a "parallel" grid axis over
        # query rows (v7x has 2 TensorCores); at this toy size (32 rows) one
        # fused invocation is the better trade on v5e/v6e/v7x.
    )(x2, g_a, b_a, wkqv_b, g_f, b_f, w1_b, b1, w2_b, b2)
    return out2.reshape(B, S, D)


# ---------------- pure-JAX reference (module semantics, all f32) ----------------
def ref_forward(x, params):
    g_a, b_a, wkqv, g_f, b_f, w1, b1, w2, b2 = params

    def ln(v, g, bb):
        mu = v.mean(-1, keepdims=True)
        var = ((v - mu) ** 2).mean(-1, keepdims=True)
        return (v - mu) / jnp.sqrt(var + EPS) * g + bb

    xn = ln(x, g_a, b_a)
    kqv = xn @ wkqv
    k, q, v = jnp.split(kqv, 3, axis=-1)
    k = k.reshape(B, S, H, DH).transpose(0, 2, 3, 1)     # (B,H,DH,S)
    q = q.reshape(B, S, H, DH).transpose(0, 2, 1, 3)     # (B,H,S,DH)
    v = v.reshape(B, S, H, DH).transpose(0, 2, 1, 3)
    slopes = jnp.array(get_alibi_slopes(H), jnp.float32)[None, :, None, None]
    rel = (jnp.arange(S)[None, :] - jnp.arange(S)[:, None]).astype(jnp.float32)
    score = q @ k / math.sqrt(D) + slopes * rel[None, None]
    mask = jnp.tril(jnp.ones((S, S)))
    score = jnp.where(mask == 0, -jnp.inf, score)
    attn = jax.nn.softmax(score, axis=-1)
    out = (attn @ v).transpose(0, 2, 1, 3).reshape(B, S, D)
    x1 = x + out
    x1n = ln(x1, g_f, b_f)
    hh = jax.nn.gelu(x1n @ w1 + b1, approximate=False)
    return x1 + (hh @ w2 + b2)


if __name__ == "__main__":
    key = jax.random.PRNGKey(0)
    ks = jax.random.split(key, 10)

    x = jax.random.normal(ks[0], (B, S, D), jnp.float32)

    # deterministic synthetic parameters (shapes per the module __init__)
    g_a = 1.0 + 0.1 * jax.random.normal(ks[6], (1, D), jnp.float32)
    b_a = 0.1 * jax.random.normal(ks[7], (1, D), jnp.float32)
    wkqv = 0.05 * jax.random.normal(ks[1], (D, 3 * D), jnp.float32)
    g_f = 1.0 + 0.1 * jax.random.normal(ks[8], (1, D), jnp.float32)
    b_f = 0.1 * jax.random.normal(ks[9], (1, D), jnp.float32)
    w1 = 0.05 * jax.random.normal(ks[2], (D, DHID), jnp.float32)
    b1 = 0.05 * jax.random.normal(ks[3], (1, DHID), jnp.float32)
    w2 = 0.05 * jax.random.normal(ks[4], (DHID, D), jnp.float32)
    b2 = 0.05 * jax.random.normal(ks[5], (1, D), jnp.float32)
    params = (g_a, b_a, wkqv, g_f, b_f, w1, b1, w2, b2)

    prepared = prepare_params(params)   # one-time bf16 weight prep (hoisted)

    out = jax.block_until_ready(alibi_transformer_layer(x, prepared))
    ref = jax.block_until_ready(ref_forward(x, params))

    assert out.shape == (B, S, D)
    assert bool(jnp.all(jnp.isfinite(out))), "non-finite output"
    # Tolerance accounts for bf16 MXU operands, approx reciprocal and tanh GELU.
    assert bool(jnp.allclose(out, ref, atol=5e-2, rtol=5e-2)), "mismatch vs reference"
    print("KERNEL_OK")
</pallas_src>

<mosaic_0001>
module attributes {stable_mosaic.version = 11 : i64} {
  func.func @alibi_layer_kernel(%arg0: i32, %arg1: memref<32x128xf32, #tpu.memory_space<vmem>>, %arg2: memref<1x128xf32, #tpu.memory_space<vmem>>, %arg3: memref<1x128xf32, #tpu.memory_space<vmem>>, %arg4: memref<128x384xbf16, #tpu.memory_space<vmem>>, %arg5: memref<1x128xf32, #tpu.memory_space<vmem>>, %arg6: memref<1x128xf32, #tpu.memory_space<vmem>>, %arg7: memref<128x128xbf16, #tpu.memory_space<vmem>>, %arg8: memref<1x128xf32, #tpu.memory_space<vmem>>, %arg9: memref<128x128xbf16, #tpu.memory_space<vmem>>, %arg10: memref<1x128xf32, #tpu.memory_space<vmem>>, %arg11: memref<32x128xf32, #tpu.memory_space<vmem>>) attributes {dimension_semantics = [#tpu.dimension_semantics<arbitrary>], iteration_bounds = array<i64: 1>, scalar_prefetch = 0 : i64, scratch_operands = 0 : i64, tpu.core_type = #tpu.core_type<tc>, window_params = [{pipeline_mode = #tpu.pipeline_mode<synchronous>, transform_indices = @transform_0, window_bounds = array<i64: 32, 128>}, {pipeline_mode = #tpu.pipeline_mode<synchronous>, transform_indices = @transform_1, window_bounds = array<i64: 1, 128>}, {pipeline_mode = #tpu.pipeline_mode<synchronous>, transform_indices = @transform_2, window_bounds = array<i64: 1, 128>}, {pipeline_mode = #tpu.pipeline_mode<synchronous>, transform_indices = @transform_3, window_bounds = array<i64: 128, 384>}, {pipeline_mode = #tpu.pipeline_mode<synchronous>, transform_indices = @transform_4, window_bounds = array<i64: 1, 128>}, {pipeline_mode = #tpu.pipeline_mode<synchronous>, transform_indices = @transform_5, window_bounds = array<i64: 1, 128>}, {pipeline_mode = #tpu.pipeline_mode<synchronous>, transform_indices = @transform_6, window_bounds = array<i64: 128, 128>}, {pipeline_mode = #tpu.pipeline_mode<synchronous>, transform_indices = @transform_7, window_bounds = array<i64: 1, 128>}, {pipeline_mode = #tpu.pipeline_mode<synchronous>, transform_indices = @transform_8, window_bounds = array<i64: 128, 128>}, {pipeline_mode = #tpu.pipeline_mode<synchronous>, transform_indices = @transform_9, window_bounds = array<i64: 1, 128>}, {pipeline_mode = #tpu.pipeline_mode<synchronous>, transform_indices = @transform_10, window_bounds = array<i64: 32, 128>}]} {
    %c0 = arith.constant 0 : index
    %c0_0 = arith.constant 0 : index
    %0 = vector.load %arg1[%c0, %c0_0] : memref<32x128xf32, #tpu.memory_space<vmem>>, vector<32x128xf32>
    %c0_1 = arith.constant 0 : index
    %c0_2 = arith.constant 0 : index
    %1 = vector.load %arg2[%c0_1, %c0_2] : memref<1x128xf32, #tpu.memory_space<vmem>>, vector<1x128xf32>
    %c0_3 = arith.constant 0 : index
    %c0_4 = arith.constant 0 : index
    %2 = vector.load %arg3[%c0_3, %c0_4] : memref<1x128xf32, #tpu.memory_space<vmem>>, vector<1x128xf32>
    %cst = arith.constant dense<0.000000e+00> : vector<32xf32>
    %3 = vector.multi_reduction <add>, %0, %cst [1] : vector<32x128xf32> to vector<32xf32>
    %4 = vector.shape_cast %3 : vector<32xf32> to vector<32x1xf32>
    %cst_5 = arith.constant 1.280000e+02 : f32
    %5 = vector.broadcast %cst_5 : f32 to vector<32x1xf32>
    %6 = arith.divf %4, %5 : vector<32x1xf32>
    %7 = vector.broadcast %6 : vector<32x1xf32> to vector<32x128xf32>
    %8 = arith.subf %0, %7 : vector<32x128xf32>
    %9 = arith.mulf %8, %8 : vector<32x128xf32>
    %cst_6 = arith.constant dense<0.000000e+00> : vector<32xf32>
    %10 = vector.multi_reduction <add>, %9, %cst_6 [1] : vector<32x128xf32> to vector<32xf32>
    %11 = vector.shape_cast %10 : vector<32xf32> to vector<32x1xf32>
    %cst_7 = arith.constant 1.280000e+02 : f32
    %12 = vector.broadcast %cst_7 : f32 to vector<32x1xf32>
    %13 = arith.divf %11, %12 : vector<32x1xf32>
    %14 = vector.broadcast %6 : vector<32x1xf32> to vector<32x128xf32>
    %15 = arith.subf %0, %14 : vector<32x128xf32>
    %cst_8 = arith.constant 9.99999974E-6 : f32
    %16 = vector.broadcast %cst_8 : f32 to vector<32x1xf32>
    %17 = arith.addf %13, %16 : vector<32x1xf32>
    %18 = math.rsqrt %17 : vector<32x1xf32>
    %19 = vector.broadcast %18 : vector<32x1xf32> to vector<32x128xf32>
    %20 = arith.mulf %15, %19 : vector<32x128xf32>
    %21 = vector.broadcast %1 : vector<1x128xf32> to vector<32x128xf32>
    %22 = arith.mulf %20, %21 : vector<32x128xf32>
    %23 = vector.broadcast %2 : vector<1x128xf32> to vector<32x128xf32>
    %24 = arith.addf %22, %23 : vector<32x128xf32>
    %25 = arith.truncf %24 : vector<32x128xf32> to vector<32x128xbf16>
    %c0_9 = arith.constant 0 : index
    %c0_10 = arith.constant 0 : index
    %26 = vector.load %arg4[%c0_9, %c0_10] : memref<128x384xbf16, #tpu.memory_space<vmem>>, vector<128x384xbf16>
    %cst_11 = arith.constant dense<0.000000e+00> : vector<32x384xf32>
    %27 = tpu.matmul %25, %26, %cst_11 {dimension_numbers = #tpu.dot_dimension_numbers<[1], [0], [0], [1], [0, 0, 1, 1], [], []>} : vector<32x128xbf16>, vector<128x384xbf16>, vector<32x384xf32> -> vector<32x384xf32>
    %28 = vector.extract_strided_slice %27 {offsets = [0, 0], sizes = [32, 128], strides = [1, 1]} : vector<32x384xf32> to vector<32x128xf32>
    %29 = vector.extract_strided_slice %27 {offsets = [0, 128], sizes = [32, 128], strides = [1, 1]} : vector<32x384xf32> to vector<32x128xf32>
    %cst_12 = arith.constant 0.0883883461 : f32
    %30 = vector.broadcast %cst_12 : f32 to vector<32x128xf32>
    %31 = arith.mulf %29, %30 : vector<32x128xf32>
    %32 = vector.extract_strided_slice %27 {offsets = [0, 256], sizes = [32, 128], strides = [1, 1]} : vector<32x384xf32> to vector<32x128xf32>
    %33 = vector.extract_strided_slice %28 {offsets = [0, 0], sizes = [32, 32], strides = [1, 1]} : vector<32x128xf32> to vector<32x32xf32>
    %34 = vector.extract_strided_slice %28 {offsets = [0, 32], sizes = [32, 32], strides = [1, 1]} : vector<32x128xf32> to vector<32x32xf32>
    %35 = vector.extract_strided_slice %28 {offsets = [0, 64], sizes = [32, 32], strides = [1, 1]} : vector<32x128xf32> to vector<32x32xf32>
    %36 = vector.extract_strided_slice %28 {offsets = [0, 96], sizes = [32, 32], strides = [1, 1]} : vector<32x128xf32> to vector<32x32xf32>
    %37 = vector.shape_cast %33 : vector<32x32xf32> to vector<1x32x32xf32>
    %38 = vector.shape_cast %34 : vector<32x32xf32> to vector<1x32x32xf32>
    %39 = vector.shape_cast %35 : vector<32x32xf32> to vector<1x32x32xf32>
    %40 = vector.shape_cast %36 : vector<32x32xf32> to vector<1x32x32xf32>
    %41 = tpu.concatenate %37, %38, %39, %40 in 0 : vector<1x32x32xf32>, vector<1x32x32xf32>, vector<1x32x32xf32>, vector<1x32x32xf32> -> vector<4x32x32xf32>
    %42 = arith.truncf %41 : vector<4x32x32xf32> to vector<4x32x32xbf16>
    %43 = vector.extract_strided_slice %31 {offsets = [0, 0], sizes = [32, 32], strides = [1, 1]} : vector<32x128xf32> to vector<32x32xf32>
    %44 = vector.extract_strided_slice %31 {offsets = [0, 32], sizes = [32, 32], strides = [1, 1]} : vector<32x128xf32> to vector<32x32xf32>
    %45 = vector.extract_strided_slice %31 {offsets = [0, 64], sizes = [32, 32], strides = [1, 1]} : vector<32x128xf32> to vector<32x32xf32>
    %46 = vector.extract_strided_slice %31 {offsets = [0, 96], sizes = [32, 32], strides = [1, 1]} : vector<32x128xf32> to vector<32x32xf32>
    %47 = vector.shape_cast %43 : vector<32x32xf32> to vector<1x32x32xf32>
    %48 = vector.shape_cast %44 : vector<32x32xf32> to vector<1x32x32xf32>
    %49 = vector.shape_cast %45 : vector<32x32xf32> to vector<1x32x32xf32>
    %50 = vector.shape_cast %46 : vector<32x32xf32> to vector<1x32x32xf32>
    %51 = tpu.concatenate %47, %48, %49, %50 in 0 : vector<1x32x32xf32>, vector<1x32x32xf32>, vector<1x32x32xf32>, vector<1x32x32xf32> -> vector<4x32x32xf32>
    %52 = arith.truncf %51 : vector<4x32x32xf32> to vector<4x32x32xbf16>
    %53 = vector.extract_strided_slice %32 {offsets = [0, 0], sizes = [32, 32], strides = [1, 1]} : vector<32x128xf32> to vector<32x32xf32>
    %54 = vector.extract_strided_slice %32 {offsets = [0, 32], sizes = [32, 32], strides = [1, 1]} : vector<32x128xf32> to vector<32x32xf32>
    %55 = vector.extract_strided_slice %32 {offsets = [0, 64], sizes = [32, 32], strides = [1, 1]} : vector<32x128xf32> to vector<32x32xf32>
    %56 = vector.extract_strided_slice %32 {offsets = [0, 96], sizes = [32, 32], strides = [1, 1]} : vector<32x128xf32> to vector<32x32xf32>
    %57 = vector.shape_cast %53 : vector<32x32xf32> to vector<1x32x32xf32>
    %58 = vector.shape_cast %54 : vector<32x32xf32> to vector<1x32x32xf32>
    %59 = vector.shape_cast %55 : vector<32x32xf32> to vector<1x32x32xf32>
    %60 = vector.shape_cast %56 : vector<32x32xf32> to vector<1x32x32xf32>
    %61 = tpu.concatenate %57, %58, %59, %60 in 0 : vector<1x32x32xf32>, vector<1x32x32xf32>, vector<1x32x32xf32>, vector<1x32x32xf32> -> vector<4x32x32xf32>
    %62 = arith.truncf %61 : vector<4x32x32xf32> to vector<4x32x32xbf16>
    "tpu.trace_start"() <{level = 10 : i32, message = "hqd,hkd->hqk"}> : () -> ()
    %cst_13 = arith.constant dense<0.000000e+00> : vector<4x32x32xf32>
    %63 = tpu.matmul %52, %42, %cst_13 {dimension_numbers = #tpu.dot_dimension_numbers<[2], [2], [1], [1], [0, 0, 0, 1, 1, 1], [0], [0]>} : vector<4x32x32xbf16>, vector<4x32x32xbf16>, vector<4x32x32xf32> -> vector<4x32x32xf32>
    "tpu.trace_stop"() : () -> ()
    %64 = tpu.iota {dimensions = array<i32: 1>} : vector<4x32x32xi32>
    %65 = tpu.iota {dimensions = array<i32: 2>} : vector<4x32x32xi32>
    %66 = tpu.iota {dimensions = array<i32: 0>} : vector<4x32x32xi32>
    %67 = arith.sitofp %64 : vector<4x32x32xi32> to vector<4x32x32xf32>
    %68 = arith.sitofp %65 : vector<4x32x32xi32> to vector<4x32x32xf32>
    %69 = arith.sitofp %66 : vector<4x32x32xi32> to vector<4x32x32xf32>
    %cst_14 = arith.constant 6.250000e-02 : f32
    %70 = vector.broadcast %cst_14 : f32 to vector<4x32x32xf32>
    %71 = arith.mulf %67, %70 : vector<4x32x32xf32>
    %72 = math.floor %71 : vector<4x32x32xf32>
    %cst_15 = arith.constant 6.250000e-02 : f32
    %73 = vector.broadcast %cst_15 : f32 to vector<4x32x32xf32>
    %74 = arith.mulf %68, %73 : vector<4x32x32xf32>
    %75 = math.floor %74 : vector<4x32x32xf32>
    %76 = arith.cmpf oeq, %72, %75 : vector<4x32x32xf32>
    %77 = arith.cmpi sle, %65, %64 : vector<4x32x32xi32>
    %cst_16 = arith.constant 1.000000e+00 : f32
    %78 = vector.broadcast %cst_16 : f32 to vector<4x32x32xf32>
    %79 = arith.addf %69, %78 : vector<4x32x32xf32>
    %cst_17 = arith.constant -1.38629436 : f32
    %80 = vector.broadcast %cst_17 : f32 to vector<4x32x32xf32>
    %81 = arith.mulf %79, %80 : vector<4x32x32xf32>
    %82 = math.exp %81 : vector<4x32x32xf32>
    %83 = arith.andi %76, %77 : vector<4x32x32xi1>
    %84 = arith.subf %68, %67 : vector<4x32x32xf32>
    %85 = arith.mulf %82, %84 : vector<4x32x32xf32>
    %cst_18 = arith.constant -1.000000e+30 : f32
    %86 = vector.broadcast %cst_18 : f32 to vector<4x32x32xf32>
    %87 = arith.select %83, %85, %86 : vector<4x32x32xi1>, vector<4x32x32xf32>
    %88 = arith.addf %63, %87 : vector<4x32x32xf32>
    %cst_19 = arith.constant dense<0xFF800000> : vector<4x32xf32>
    %89 = vector.multi_reduction <maximumf>, %88, %cst_19 [2] : vector<4x32x32xf32> to vector<4x32xf32>
    %90 = vector.shape_cast %89 : vector<4x32xf32> to vector<4x32x1xf32>
    %91 = vector.broadcast %90 : vector<4x32x1xf32> to vector<4x32x32xf32>
    %92 = arith.subf %88, %91 : vector<4x32x32xf32>
    %93 = math.exp %92 : vector<4x32x32xf32>
    %cst_20 = arith.constant dense<0.000000e+00> : vector<4x32xf32>
    %94 = vector.multi_reduction <add>, %93, %cst_20 [2] : vector<4x32x32xf32> to vector<4x32xf32>
    %95 = vector.shape_cast %94 : vector<4x32xf32> to vector<4x32x1xf32>
    %96 = tpu.reciprocal %95 {approx = true} : vector<4x32x1xf32> -> vector<4x32x1xf32>
    %97 = vector.broadcast %96 : vector<4x32x1xf32> to vector<4x32x32xf32>
    %98 = arith.mulf %93, %97 : vector<4x32x32xf32>
    %99 = arith.truncf %98 : vector<4x32x32xf32> to vector<4x32x32xbf16>
    "tpu.trace_start"() <{level = 10 : i32, message = "hqk,hkd->qhd"}> : () -> ()
    %cst_21 = arith.constant dense<0.000000e+00> : vector<4x32x32xf32>
    %100 = tpu.matmul %62, %99, %cst_21 {dimension_numbers = #tpu.dot_dimension_numbers<[1], [2], [2], [1], [0, 0, 0, 2, 1, 1], [0], [0]>} : vector<4x32x32xbf16>, vector<4x32x32xbf16>, vector<4x32x32xf32> -> vector<4x32x32xf32>
    %101 = tpu.transpose %100, [2, 0, 1] : vector<4x32x32xf32> -> vector<32x4x32xf32>
    "tpu.trace_stop"() : () -> ()
    %102 = vector.shape_cast %101 : vector<32x4x32xf32> to vector<32x128xf32>
    %103 = arith.addf %0, %102 : vector<32x128xf32>
    %c0_22 = arith.constant 0 : index
    %c0_23 = arith.constant 0 : index
    %104 = vector.load %arg5[%c0_22, %c0_23] : memref<1x128xf32, #tpu.memory_space<vmem>>, vector<1x128xf32>
    %c0_24 = arith.constant 0 : index
    %c0_25 = arith.constant 0 : index
    %105 = vector.load %arg6[%c0_24, %c0_25] : memref<1x128xf32, #tpu.memory_space<vmem>>, vector<1x128xf32>
    %cst_26 = arith.constant dense<0.000000e+00> : vector<32xf32>
    %106 = vector.multi_reduction <add>, %103, %cst_26 [1] : vector<32x128xf32> to vector<32xf32>
    %107 = vector.shape_cast %106 : vector<32xf32> to vector<32x1xf32>
    %cst_27 = arith.constant 1.280000e+02 : f32
    %108 = vector.broadcast %cst_27 : f32 to vector<32x1xf32>
    %109 = arith.divf %107, %108 : vector<32x1xf32>
    %110 = vector.broadcast %109 : vector<32x1xf32> to vector<32x128xf32>
    %111 = arith.subf %103, %110 : vector<32x128xf32>
    %112 = arith.mulf %111, %111 : vector<32x128xf32>
    %cst_28 = arith.constant dense<0.000000e+00> : vector<32xf32>
    %113 = vector.multi_reduction <add>, %112, %cst_28 [1] : vector<32x128xf32> to vector<32xf32>
    %114 = vector.shape_cast %113 : vector<32xf32> to vector<32x1xf32>
    %cst_29 = arith.constant 1.280000e+02 : f32
    %115 = vector.broadcast %cst_29 : f32 to vector<32x1xf32>
    %116 = arith.divf %114, %115 : vector<32x1xf32>
    %117 = vector.broadcast %109 : vector<32x1xf32> to vector<32x128xf32>
    %118 = arith.subf %103, %117 : vector<32x128xf32>
    %cst_30 = arith.constant 9.99999974E-6 : f32
    %119 = vector.broadcast %cst_30 : f32 to vector<32x1xf32>
    %120 = arith.addf %116, %119 : vector<32x1xf32>
    %121 = math.rsqrt %120 : vector<32x1xf32>
    %122 = vector.broadcast %121 : vector<32x1xf32> to vector<32x128xf32>
    %123 = arith.mulf %118, %122 : vector<32x128xf32>
    %124 = vector.broadcast %104 : vector<1x128xf32> to vector<32x128xf32>
    %125 = arith.mulf %123, %124 : vector<32x128xf32>
    %126 = vector.broadcast %105 : vector<1x128xf32> to vector<32x128xf32>
    %127 = arith.addf %125, %126 : vector<32x128xf32>
    %128 = arith.truncf %127 : vector<32x128xf32> to vector<32x128xbf16>
    %c0_31 = arith.constant 0 : index
    %c0_32 = arith.constant 0 : index
    %129 = vector.load %arg7[%c0_31, %c0_32] : memref<128x128xbf16, #tpu.memory_space<vmem>>, vector<128x128xbf16>
    %cst_33 = arith.constant dense<0.000000e+00> : vector<32x128xf32>
    %130 = tpu.matmul %128, %129, %cst_33 {dimension_numbers = #tpu.dot_dimension_numbers<[1], [0], [0], [1], [0, 0, 1, 1], [], []>} : vector<32x128xbf16>, vector<128x128xbf16>, vector<32x128xf32> -> vector<32x128xf32>
    %c0_34 = arith.constant 0 : index
    %c0_35 = arith.constant 0 : index
    %131 = vector.load %arg8[%c0_34, %c0_35] : memref<1x128xf32, #tpu.memory_space<vmem>>, vector<1x128xf32>
    %132 = vector.broadcast %131 : vector<1x128xf32> to vector<32x128xf32>
    %133 = arith.addf %130, %132 : vector<32x128xf32>
    %134 = arith.mulf %133, %133 : vector<32x128xf32>
    %135 = arith.mulf %133, %134 : vector<32x128xf32>
    %cst_36 = arith.constant 4.471500e-02 : f32
    %136 = vector.broadcast %cst_36 : f32 to vector<32x128xf32>
    %137 = arith.mulf %136, %135 : vector<32x128xf32>
    %138 = arith.addf %133, %137 : vector<32x128xf32>
    %cst_37 = arith.constant 0.797884583 : f32
    %139 = vector.broadcast %cst_37 : f32 to vector<32x128xf32>
    %140 = arith.mulf %139, %138 : vector<32x128xf32>
    %141 = math.tanh %140 : vector<32x128xf32>
    %cst_38 = arith.constant 1.000000e+00 : f32
    %142 = vector.broadcast %cst_38 : f32 to vector<32x128xf32>
    %143 = arith.addf %142, %141 : vector<32x128xf32>
    %cst_39 = arith.constant 5.000000e-01 : f32
    %144 = vector.broadcast %cst_39 : f32 to vector<32x128xf32>
    %145 = arith.mulf %144, %143 : vector<32x128xf32>
    %146 = arith.mulf %133, %145 : vector<32x128xf32>
    %147 = arith.truncf %146 : vector<32x128xf32> to vector<32x128xbf16>
    %c0_40 = arith.constant 0 : index
    %c0_41 = arith.constant 0 : index
    %148 = vector.load %arg9[%c0_40, %c0_41] : memref<128x128xbf16, #tpu.memory_space<vmem>>, vector<128x128xbf16>
    %cst_42 = arith.constant dense<0.000000e+00> : vector<32x128xf32>
    %149 = tpu.matmul %147, %148, %cst_42 {dimension_numbers = #tpu.dot_dimension_numbers<[1], [0], [0], [1], [0, 0, 1, 1], [], []>} : vector<32x128xbf16>, vector<128x128xbf16>, vector<32x128xf32> -> vector<32x128xf32>
    %c0_43 = arith.constant 0 : index
    %c0_44 = arith.constant 0 : index
    %150 = vector.load %arg10[%c0_43, %c0_44] : memref<1x128xf32, #tpu.memory_space<vmem>>, vector<1x128xf32>
    %151 = vector.broadcast %150 : vector<1x128xf32> to vector<32x128xf32>
    %152 = arith.addf %149, %151 : vector<32x128xf32>
    %153 = arith.addf %103, %152 : vector<32x128xf32>
    %c0_45 = arith.constant 0 : index
    %c0_46 = arith.constant 0 : index
    %154 = vector.load %arg11[%c0_45, %c0_46] : memref<32x128xf32, #tpu.memory_space<vmem>>, vector<32x128xf32>
    tpu.vector_store %arg11[%c0_45, %c0_46], %153 {strides = array<i32>} : memref<32x128xf32, #tpu.memory_space<vmem>>, vector<32x128xf32>,
    return
  }
  func.func @transform_0(%arg0: i32) -> (i32, i32) {
    %c0_i32 = arith.constant 0 : i32
    %c0_i32_0 = arith.constant 0 : i32
    %c0_i32_1 = arith.constant 0 : i32
    return %c0_i32, %c0_i32_0 : i32, i32
  }
  func.func @transform_1(%arg0: i32) -> (i32, i32) {
    %c0_i32 = arith.constant 0 : i32
    %c0_i32_0 = arith.constant 0 : i32
    %c0_i32_1 = arith.constant 0 : i32
    return %c0_i32, %c0_i32_0 : i32, i32
  }
  func.func @transform_2(%arg0: i32) -> (i32, i32) {
    %c0_i32 = arith.constant 0 : i32
    %c0_i32_0 = arith.constant 0 : i32
    %c0_i32_1 = arith.constant 0 : i32
    return %c0_i32, %c0_i32_0 : i32, i32
  }
  func.func @transform_3(%arg0: i32) -> (i32, i32) {
    %c0_i32 = arith.constant 0 : i32
    %c0_i32_0 = arith.constant 0 : i32
    %c0_i32_1 = arith.constant 0 : i32
    return %c0_i32, %c0_i32_0 : i32, i32
  }
  func.func @transform_4(%arg0: i32) -> (i32, i32) {
    %c0_i32 = arith.constant 0 : i32
    %c0_i32_0 = arith.constant 0 : i32
    %c0_i32_1 = arith.constant 0 : i32
    return %c0_i32, %c0_i32_0 : i32, i32
  }
  func.func @transform_5(%arg0: i32) -> (i32, i32) {
    %c0_i32 = arith.constant 0 : i32
    %c0_i32_0 = arith.constant 0 : i32
    %c0_i32_1 = arith.constant 0 : i32
    return %c0_i32, %c0_i32_0 : i32, i32
  }
  func.func @transform_6(%arg0: i32) -> (i32, i32) {
    %c0_i32 = arith.constant 0 : i32
    %c0_i32_0 = arith.constant 0 : i32
    %c0_i32_1 = arith.constant 0 : i32
    return %c0_i32, %c0_i32_0 : i32, i32
  }
  func.func @transform_7(%arg0: i32) -> (i32, i32) {
    %c0_i32 = arith.constant 0 : i32
    %c0_i32_0 = arith.constant 0 : i32
    %c0_i32_1 = arith.constant 0 : i32
    return %c0_i32, %c0_i32_0 : i32, i32
  }
  func.func @transform_8(%arg0: i32) -> (i32, i32) {
    %c0_i32 = arith.constant 0 : i32
    %c0_i32_0 = arith.constant 0 : i32
    %c0_i32_1 = arith.constant 0 : i32
    return %c0_i32, %c0_i32_0 : i32, i32
  }
  func.func @transform_9(%arg0: i32) -> (i32, i32) {
    %c0_i32 = arith.constant 0 : i32
    %c0_i32_0 = arith.constant 0 : i32
    %c0_i32_1 = arith.constant 0 : i32
    return %c0_i32, %c0_i32_0 : i32, i32
  }
  func.func @transform_10(%arg0: i32) -> (i32, i32) {
    %c0_i32 = arith.constant 0 : i32
    %c0_i32_0 = arith.constant 0 : i32
    %c0_i32_1 = arith.constant 0 : i32
    return %c0_i32, %c0_i32_0 : i32, i32
  }
}

</mosaic_0001>

<bundles_post_ra>
// kernel: tpu_custom_call.1
= control target key start
LH: loop header
LB: loop body
LE: loop exit
PB: predicated region body
PF: predicated region fallthrough
CT: control target
= control target key end

     0   :  { %15 = vsyncpa [#allocation3], 0  ;;  %s3745_s0 = inlined_call_operand.hbm [shape: f32[32,128], index: 0, kind: input, shape index: {}]   ;;  %s3746_s1 = inlined_call_operand.vmem [shape: f32[1,128], index: 1, kind: input, shape index: {}]   ;;  %s3747_s2 = inlined_call_operand.vmem [shape: f32[1,128], index: 2, kind: input, shape index: {}]   ;;  %s3748_s3 = inlined_call_operand.hbm [shape: bf16[128,384], index: 3, kind: input, shape index: {}]   ;;  %s3749_s4 = inlined_call_operand.vmem [shape: f32[1,128], index: 4, kind: input, shape index: {}]   ;;  %s3750_s5 = inlined_call_operand.vmem [shape: f32[1,128], index: 5, kind: input, shape index: {}]   ;;  %s3751_s6 = inlined_call_operand.hbm [shape: bf16[128,128], index: 6, kind: input, shape index: {}]   ;;  %s3752_s7 = inlined_call_operand.vmem [shape: f32[1,128], index: 7, kind: input, shape index: {}]   ;;  %s3753_s8 = inlined_call_operand.hbm [shape: bf16[128,128], index: 8, kind: input, shape index: {}]   ;;  %s3754_s9 = inlined_call_operand.vmem [shape: f32[1,128], index: 9, kind: input, shape index: {}]   ;;  %s3755_s10 = inlined_call_operand.hbm [shape: f32[32,128], index: 10, kind: output, shape index: {}]  }
   0x1   :  { %16 = vsyncpa [#allocation6], 0 }
   0x2   :  { %17 = vsyncpa [#allocation9], 0 }
   0x3   :  { %18 = vsyncpa [#allocation4], 0  ;;  %s3140_s13 = smov [#allocation5]  }
   0x4   :  { %s40_s14 = sshll.u32 %s3140_s13, 4  ;;  %s41_s14 = int_to_ptr.vmem [resolvable:$true] %s40_s14 }
   0x5   :  { %s3040_s15 = scalar_lea.vmem %s41_s14, 3072  ;;  %p3045_p1 = scmp.lt.s32.totalorder %s41_s14, %s41_s14 }
   0x6   :  { %p3041_p0 = scmp.ne.s32.totalorder %s41_s14, %s3040_s15  ;;  %p3046_p2 = scmp.lt.s32.totalorder %s3040_s15, %s3040_s15 }
   0x8   :  { %p3047_p3 = por %p3046_p2, %p3045_p1 }
   0xa   :  { %p3048_p4 = pnand %p3047_p3, %p3041_p0 }
   0xc   :  { %3051 = shalt.err (!%p3048_p4)
}
   0xd   :  { %s3141_s16 = smov 192   ;;  %s3142_s17 = smov 12  }
   0xe   :  { %46 = dma.hbm_to_vmem [thread:$0]  %s3748_s3, 3072, %s41_s14, [#allocation6], %s3141_s16, %s3141_s16, %s3142_s17  }
   0xf   :  { %s3143_s20 = smov [#allocation2]  }
  0x10   :  { %s24_s21 = sshll.u32 %s3143_s20, 4  ;;  %s25_s21 = int_to_ptr.vmem [resolvable:$true] %s24_s21 }
  0x11   :  { %s3060_s22 = scalar_lea.vmem %s25_s21, 512  ;;  %p3065_p6 = scmp.lt.s32.totalorder %s25_s21, %s25_s21 }
  0x12   :  { %p3061_p5 = scmp.ne.s32.totalorder %s25_s21, %s3060_s22  ;;  %p3066_p7 = scmp.lt.s32.totalorder %s3060_s22, %s3060_s22 }
  0x14   :  { %p3067_p8 = por %p3066_p7, %p3065_p6 }
  0x16   :  { %p3068_p9 = pnand %p3067_p8, %p3061_p5 }
  0x18   :  { %3071 = shalt.err (!%p3068_p9)
}
  0x19   :  { %s3144_s23 = smov 128   ;;  %s3145_s24 = smov 8  }
  0x1a   :  { %30 = dma.hbm_to_vmem [thread:$0]  %s3745_s0, 512, %s25_s21, [#allocation3], %s3144_s23, %s3144_s23, %s3145_s24  }
  0x1b   :  { %s3146_s3 = smov [#allocation7]  }
  0x1c   :  { %s56_s27 = sshll.u32 %s3146_s3, 4  ;;  %s57_s27 = int_to_ptr.vmem [resolvable:$true] %s56_s27 }
  0x1d   :  { %s3080_s28 = scalar_lea.vmem %s57_s27, 1024  ;;  %p3085_p11 = scmp.lt.s32.totalorder %s57_s27, %s57_s27 }
  0x1e   :  { %p3081_p10 = scmp.ne.s32.totalorder %s57_s27, %s3080_s28  ;;  %p3086_p12 = scmp.lt.s32.totalorder %s3080_s28, %s3080_s28 }
  0x20   :  { %p3087_p13 = por %p3086_p12, %p3085_p11 }
  0x22   :  { %p3088_p0 = pnand %p3087_p13, %p3081_p10 }
  0x24   :  { %3091 = shalt.err (!%p3088_p0)
}
  0x25   :  { %s3147_s29 = smov 64   ;;  %s3148_s30 = smov 4  }
  0x26   :  { %62 = dma.hbm_to_vmem [thread:$0]  %s3751_s6, 1024, %s57_s27, [#allocation6], %s3147_s29, %s3147_s29, %s3148_s30  }
  0x27   :  { %s3149_s13 = smov [#allocation8]  }
  0x28   :  { %s70_s0 = sshll.u32 %s3149_s13, 4  ;;  %s71_s0 = int_to_ptr.vmem [resolvable:$true] %s70_s0 }
  0x29   :  { %s3100_s14 = scalar_lea.vmem %s71_s0, 1024  ;;  %p3105_p2 = scmp.lt.s32.totalorder %s71_s0, %s71_s0 }
  0x2a   :  { %p3101_p1 = scmp.ne.s32.totalorder %s71_s0, %s3100_s14  ;;  %p3106_p3 = scmp.lt.s32.totalorder %s3100_s14, %s3100_s14 }
  0x2c   :  { %p3107_p4 = por %p3106_p3, %p3105_p2 }
  0x2e   :  { %p3108_p5 = pnand %p3107_p4, %p3101_p1 }
  0x30   :  { %3111 = shalt.err (!%p3108_p5)
}
  0x31   :  { %76 = dma.hbm_to_vmem [thread:$0]  %s3753_s8, 1024, %s71_s0, [#allocation9], %s3147_s29, %s3147_s29, %s3148_s30  }
  0x32   :  { %3132 = dma.done.wait [#allocation3], 512  }
  0x33   :  { %3133 = vsyncadd [#allocation3], 4294966784 }
  0x34   :  { %3134 = dma.done.wait [#allocation6], 4096  }
  0x35   :  { %3135 = vsyncadd [#allocation6], 4294963200 }
  0x36   :  { %3136 = dma.done.wait [#allocation9], 1024  }
  0x37   :  { %3137 = vsyncadd [#allocation9], 4294966272  ;;  %v92_v0 = vld [vmem:[#allocation2] sm:$0xff]  ;;  %v94_v1 = vld [vmem:[#allocation2 + $0x10] sm:$0xff]  ;;  %v3150_v39 = vmov 0   ;;  %vm665_vm0 = vcmask 261120  }
  0x38   :  { %v93_v2 = vld [vmem:[#allocation2 + $0x8] sm:$0xff]  ;;  %98 = vadd.xlane.f32.xlu0 %v92_v0  ;;  %102 = vadd.xlane.f32.xlu1 %v94_v1  ;;  %v95_v3 = vld [vmem:[#allocation2 + $0x18] sm:$0xff]  ;;  %v2895_v22 = vld [vmem:[#allocation5 + $0x94] ss:$12 sps:$4 sm:$0xff]   ;;  %vm2126_vm13 = vcmask 523264   ;;  %vm2131_vm14 = vcmask 785408  }
  0x39   :  { %v2892_v4 = vld [vmem:[#allocation5 + $0xac] ss:$12 sps:$4 sm:$0xff]   ;;  %v2894_v5 = vld [vmem:[#allocation5 + $0xa8] ss:$12 sps:$4 sm:$0xff]   ;;  %v2897_v23 = vld [vmem:[#allocation5 + $0xb0] ss:$12 sps:$4 sm:$0xff]   ;;  %357 = vmatprep.mubr.bf16.mxu0 %v3150_v39 }
  0x3a   :  { %325 = vmatprep.subr.bf16.mxu0 %v2892_v4  ;;  %v2898_v24 = vld [vmem:[#allocation5 + $0x90] ss:$12 sps:$4 sm:$0xff]   ;;  %2645 = vmatprep.subr.bf16.mxu1 %v2897_v23  ;;  %v2901_v26 = vld [vmem:[#allocation5 + $0x98] ss:$12 sps:$4 sm:$0xff]   ;;  %v2905_v29 = vld [vmem:[#allocation5 + $0x80] ss:$12 sps:$4 sm:$0xff]  }
  0x3b   :  { %326 = vmatpush1.bf16.msra.mxu0 %v2894_v5  ;;  %2646 = vmatpush3.bf16.msra.mxu1 %v2897_v23  ;;  %v2899_v25 = vld [vmem:[#allocation5 + $0x7c] ss:$12 sps:$4 sm:$0xff]   ;;  %v2902_v27 = vld [vmem:[#allocation5 + $0x78] ss:$12 sps:$4 sm:$0xff]   ;;  %v2906_v30 = vld [vmem:[#allocation5 + $0x60] ss:$12 sps:$4 sm:$0xff]  }
  0x3c   :  { %100 = vadd.xlane.f32.xlu0 %v93_v2  ;;  %104 = vadd.xlane.f32.xlu1 %v95_v3  ;;  %v2903_v28 = vld [vmem:[#allocation5 + $0x64] ss:$12 sps:$4 sm:$0xff]   ;;  %v2907_v31 = vld [vmem:[#allocation5 + $0x4c] ss:$12 sps:$4 sm:$0xff]   ;;  %v2909_v32 = vld [vmem:[#allocation5 + $0x68] ss:$12 sps:$4 sm:$0xff]  }
  0x3d   :  { %327 = vmatprep.subr.bf16.mxu0 %v2895_v22  ;;  %2647 = vmatprep.subr.bf16.mxu1 %v2901_v26  ;;  %v2910_v33 = vld [vmem:[#allocation5 + $0x48] ss:$12 sps:$4 sm:$0xff]   ;;  %v2913_v35 = vld [vmem:[#allocation5 + $0x50] ss:$12 sps:$4 sm:$0xff]   ;;  %v2917_v38 = vld [vmem:[#allocation5 + $0x38] ss:$12 sps:$4 sm:$0xff]  }
  0x3e   :  { %v2911_v34 = vld [vmem:[#allocation5 + $0x34] ss:$12 sps:$4 sm:$0xff]   ;;  %v2914_v36 = vld [vmem:[#allocation5 + $0x30] ss:$12 sps:$4 sm:$0xff]   ;;  %v2918_v40 = vld [vmem:[#allocation5 + $0x18] ss:$12 sps:$4 sm:$0xff]  }
  0x3f   :  { %328 = vmatpush1.bf16.msra.mxu0 %v2898_v24  ;;  %2648 = vmatpush3.bf16.msra.mxu1 %v2901_v26  ;;  %v2915_v37 = vld [vmem:[#allocation5 + $0x1c] ss:$12 sps:$4 sm:$0xff]   ;;  %v2919_v41 = vld [vmem:[#allocation5 + $0x4] ss:$12 sps:$4 sm:$0xff]   ;;  %v2921_v42 = vld [vmem:[#allocation5 + $0x20] ss:$12 sps:$4 sm:$0xff]  }
  0x40   :  { %329 = vmatprep.subr.bf16.mxu0 %v2899_v25  ;;  %2649 = vmatprep.subr.bf16.mxu1 %v2905_v29  ;;  %v2922_v43 = vld [vmem:[#allocation5] ss:$12 sps:$4 sm:$0xff]   ;;  %v2923_v44 = vld [vmem:[#allocation5 + $0x8] ss:$12 sps:$4 sm:$0xff]   ;;  %s3155_s26 = smov [#allocation10]  }
  0x41   :  { %v2513_v59 = vld [vmem:[%s3746_s1] ss:$0 sm:$0xff]  ;;  %s3151_s1 = smov 96   ;;  %s2499_s3 = sshll.u32 %s3155_s26, 4  ;;  %s2500_s3 = int_to_ptr.vmem [resolvable:$true] %s2499_s3 }
  0x42   :  { %p3117_p7 = scmp.lt.s32.totalorder %s2500_s3, %s2500_s3 }
  0x43   :  { %330 = vmatpush1.bf16.msra.mxu0 %v2902_v27  ;;  %2650 = vmatpush3.bf16.msra.mxu1 %v2905_v29 }
  0x44   :  { %331 = vmatprep.subr.bf16.mxu0 %v2903_v28  ;;  %2651 = vmatprep.subr.bf16.mxu1 %v2909_v32 }
  0x47   :  { %332 = vmatpush1.bf16.msra.mxu0 %v2906_v30  ;;  %2652 = vmatpush3.bf16.msra.mxu1 %v2909_v32 }
  0x48   :  { %333 = vmatprep.subr.bf16.mxu0 %v2907_v31  ;;  %2653 = vmatprep.subr.bf16.mxu1 %v2913_v35 }
  0x4b   :  { %334 = vmatpush1.bf16.msra.mxu0 %v2910_v33  ;;  %2654 = vmatpush3.bf16.msra.mxu1 %v2913_v35 }
  0x4c   :  { %335 = vmatprep.subr.bf16.mxu0 %v2911_v34  ;;  %2655 = vmatprep.subr.bf16.mxu1 %v2917_v38 }
  0x4f   :  { %336 = vmatpush1.bf16.msra.mxu0 %v2914_v36  ;;  %2656 = vmatpush3.bf16.msra.mxu1 %v2917_v38 }
  0x50   :  { %337 = vmatprep.subr.bf16.mxu0 %v2915_v37  ;;  %2657 = vmatprep.subr.bf16.mxu1 %v2921_v42 }
  0x53   :  { %338 = vmatpush1.bf16.msra.mxu0 %v2918_v40  ;;  %2658 = vmatpush3.bf16.msra.mxu1 %v2921_v42 }
  0x54   :  { %339 = vmatprep.subr.bf16.mxu0 %v2919_v41  ;;  %2659 = vmatprep.subr.bf16.mxu1 %v2923_v44 }
  0x57   :  { %340 = vmatpush1.bf16.msra.mxu0 %v2922_v43  ;;  %2660 = vmatpush3.bf16.msra.mxu1 %v2923_v44 }
  0xc1   :  { %v99_v6 = vpop.xlane.xlu0 %98  ;;  %v103_v7 = vpop.xlane.xlu1 %102 }
  0xc2   :  { %v107_v8 = vmul.f32 0.0078125, %v99_v6  ;;  %v109_v9 = vmul.f32 0.0078125, %v103_v7 }
  0xc4   :  { %v3230_v10 = vsub.f32 %v92_v0, %v107_v8  ;;  %v3232_v11 = vsub.f32 %v94_v1, %v109_v9  ;;  %v2514_v0 = vld [vmem:[%s3747_s2] ss:$0 sm:$0xff]  ;;  %s3152_s2 = smov 32  }
  0xc5   :  { %v101_v12 = vpop.xlane.xlu0 %100  ;;  %v105_v13 = vpop.xlane.xlu1 %104 }
  0xc6   :  { %v108_v14 = vmul.f32 0.0078125, %v101_v12  ;;  %v115_v15 = vmul.f32 %v3230_v10, %v3230_v10  ;;  %v110_v16 = vmul.f32 0.0078125, %v105_v13  ;;  %v117_v17 = vmul.f32 %v3232_v11, %v3232_v11 }
  0xc8   :  { %119 = vadd.xlane.f32.xlu0 %v115_v15  ;;  %v3238_v18 = vsub.f32 %v93_v2, %v108_v14  ;;  %v3240_v19 = vsub.f32 %v95_v3, %v110_v16 }
  0xca   :  { %v116_v20 = vmul.f32 %v3238_v18, %v3238_v18  ;;  %v118_v21 = vmul.f32 %v3240_v19, %v3240_v19 }
  0xcc   :  { %123 = vadd.xlane.f32.xlu0 %v117_v17  ;;  %121 = vadd.xlane.f32.xlu1 %v116_v20 }
  0xd0   :  { %125 = vadd.xlane.f32.xlu1 %v118_v21 }
 0x151   :  { %v120_v45 = vpop.xlane.xlu0 %119 }
 0x152   :  { %v127_v46 = vmul.f32 0.0078125, %v120_v45 }
 0x154   :  { %v131_v47 = vadd.f32 1e-05, %v127_v46 }
 0x155   :  { %v122_v48 = vpop.xlane.xlu1 %121  ;;  %v124_v49 = vpop.xlane.xlu0 %123 }
 0x156   :  { %2940 = vrsqrt.f32 %v131_v47  ;;  %v128_v50 = vmul.f32 0.0078125, %v122_v48  ;;  %v129_v51 = vmul.f32 0.0078125, %v124_v49 }
 0x158   :  { %v132_v52 = vadd.f32 1e-05, %v128_v50  ;;  %v133_v53 = vadd.f32 1e-05, %v129_v51 }
 0x159   :  { %v126_v54 = vpop.xlane.xlu1 %125 }
 0x15a   :  { %2942 = vrsqrt.f32 %v132_v52  ;;  %v130_v55 = vmul.f32 0.0078125, %v126_v54 }
 0x15b   :  { %2944 = vrsqrt.f32 %v133_v53 }
 0x15c   :  { %v134_v56 = vadd.f32 1e-05, %v130_v55 }
 0x15e   :  { %2946 = vrsqrt.f32 %v134_v56 }
 0x163   :  { %v2941_v57 = vpop.eup %2940 }
 0x164   :  { %v139_v58 = vmul.f32 %v2941_v57, %v3230_v10 }
 0x166   :  { %v149_v63 = vmul.f32 %v2513_v59, %v139_v58 }
 0x167   :  { %v2943_v60 = vpop.eup %2942 }
 0x168   :  { %v2945_v61 = vpop.eup %2944  ;;  %v140_v62 = vmul.f32 %v2943_v60, %v3238_v18  ;;  %v159_v4 = vadd.f32 %v2514_v0, %v149_v63 }
 0x169   :  { %v141_v1 = vmul.f32 %v2945_v61, %v3232_v11 }
 0x16a   :  { %v150_v2 = vmul.f32 %v2513_v59, %v140_v62 }
 0x16b   :  { %v2947_v3 = vpop.eup %2946  ;;  %v151_v7 = vmul.f32 %v2513_v59, %v141_v1 }
 0x16c   :  { %v160_v5 = vadd.f32 %v2514_v0, %v150_v2  ;;  %v142_v6 = vmul.f32 %v2947_v3, %v3240_v19 }
 0x16d   :  { %v161_v10 = vadd.f32 %v2514_v0, %v151_v7 }
 0x16e   :  { %v163_v8 = vpack.c.bf16 %v160_v5, %v159_v4  ;;  %v152_v9 = vmul.f32 %v2513_v59, %v142_v6 }
 0x170   :  { %358 = vmatmul.mubr.bf16.vlgmr.msra.gmra.mxu0 %v163_v8  ;;  %2661 = vmatprep.mubr.bf16.mxu1 %v163_v8  ;;  %v162_v12 = vadd.f32 %v2514_v0, %v152_v9 }
 0x171   :  { %367 = vmatprep.mubr.bf16.mxu0 %v3150_v39 }
 0x172   :  { %v164_v13 = vpack.c.bf16 %v162_v12, %v161_v10 }
 0x174   :  { %2662 = vmatmul.mubr.bf16.vlgmr.msra.gmra.mxu1 %v164_v13 }
 0x178   :  { %368 = vmatmul.mubr.bf16.gmra.mxu0 %v164_v13 }
 0x230   :  { %v359_v14 = vpop.f32.mrf.mxu0 }
 0x232   :  { %v361_v15 = vpop.f32.mrf.mxu0 }
 0x233   :  { %v427_v19 = vmul.f32 0.088388346, %v361_v15 }
 0x234   :  { %v363_v11 = vpop.f32.mrf.mxu0  ;;  %v3256_v16 = vpop.f32.mrf.mxu1 }
 0x235   :  { %v2807_v17 = vpack.i.bf16 %v363_v11, %v359_v14  ;;  %v471_v36 = vpack.c.bf16 %v363_v11, %v359_v14 }
 0x236   :  { %v365_v18 = vpop.f32.mrf.mxu0  ;;  %v3258_v20 = vpop.f32.mrf.mxu1 }
 0x237   :  { %v428_v21 = vmul.f32 0.088388346, %v365_v18  ;;  %2808 = vrot.lane.b32.xlu1 %v2807_v17, %s3151_s1  ;;  %v673_v38 = vsel %vm665_vm0, %v471_v36, 0 }
 0x238   :  { %v369_v22 = vpop.f32.mrf.mxu0  ;;  %v3261_v23 = vpop.f32.mrf.mxu1 }
 0x239   :  { %v2812_v24 = vpack.i.bf16 %v428_v21, %v427_v19  ;;  %v519_v25 = vpack.c.bf16 %v428_v21, %v427_v19  ;;  %v3265_v27 = vpack.i.bf16 %v3261_v23, %v3256_v16  ;;  %v568_v28 = vpack.c.bf16 %v3261_v23, %v3256_v16 }
 0x23a   :  { %v371_v26 = vpop.f32.mrf.mxu0 }
 0x23b   :  { %2813 = vrot.lane.b32.xlu1 %v2812_v24, %s3151_s1  ;;  %2669 = vmatprep.mubr.msk.bf16.mxu0 %vm665_vm0, %v519_v25  ;;  %v429_v33 = vmul.f32 0.088388346, %v371_v26 }
 0x23c   :  { %v373_v29 = vpop.f32.mrf.mxu0 }
 0x23d   :  { %v472_v30 = vpack.c.bf16 %v373_v29, %v369_v22  ;;  %v2817_v31 = vpack.i.bf16 %v373_v29, %v369_v22 }
 0x23e   :  { %v375_v32 = vpop.f32.mrf.mxu0 }
 0x23f   :  { %v430_v34 = vmul.f32 0.088388346, %v375_v32  ;;  %2818 = vrot.lane.b32.xlu1 %v2817_v31, %s3147_s29  ;;  %2803 = vrot.lane.b32.xlu0 %v2817_v31, %s3151_s1  ;;  %v676_v35 = vsel %vm665_vm0, %v472_v30, 0 }
 0x240   :  { %2769 = vmatprep.subr.msk.bf16.mxu0 %vm665_vm0, %v472_v30 }
 0x241   :  { %2666 = vmatpush3.bf16.xpose.msra.mxu0 %v676_v35  ;;  %v2827_v37 = vpack.i.bf16 %v430_v34, %v429_v33  ;;  %v520_v39 = vpack.c.bf16 %v430_v34, %v429_v33  ;;  %v575_v35 = vlaneseq }
 0x242   :  { %2770 = vmatprep.subr.msk.bf16.mxu0 %vm665_vm0, %v471_v36 }
 0x243   :  { %2823 = vrot.lane.b32.xlu0 %v2817_v31, %s3152_s2  ;;  %2828 = vrot.lane.b32.xlu1 %v2827_v37, %s3151_s1  ;;  %v3304_v36 = vshrl.u32 %v575_v35, 7 }
 0x247   :  { %2833 = vrot.lane.b32.xlu0 %v2807_v17, %s3147_s29  ;;  %2838 = vrot.lane.b32.xlu1 %v2807_v17, %s3152_s2 }
 0x249   :  { %2668 = vmatpush3.bf16.xpose.msra.mxu0 %v673_v38  ;;  %v581_v38 = vand.u32 127, %v575_v35 }
 0x24b   :  { %2843 = vrot.lane.b32.xlu0 %v2812_v24, %s3147_s29  ;;  %2848 = vrot.lane.b32.xlu1 %v2812_v24, %s3152_s2  ;;  %vm605_vm4 = vcmp.le.s32.totalorder %v581_v38, %v3304_v36 }
 0x24f   :  { %2853 = vrot.lane.b32.xlu0 %v2827_v37, %s3147_s29  ;;  %2858 = vrot.lane.b32.xlu1 %v2827_v37, %s3152_s2  ;;  %v578_v37 = vadd.s32 16, %v3304_v36 }
 0x250   :  { %2670 = vmatmul.mubr.msk.bf16.vlgmr.msra.gmra.mxu0 %vm665_vm0, %v520_v39 }
 0x251   :  { %v584_v39 = vcvt.s32.f32 %v578_v37  ;;  %vm607_vm2 = vcmp.le.s32.totalorder %v581_v38, %v578_v37 }
 0x2a9   :  { %v2809_v40 = vpop.permute.xlu1 %2808 }
 0x2aa   :  { %v2811_v51 = vunpack.i.h.bf16 %v2809_v40  ;;  %v2810_v52 = vunpack.i.l.bf16 %v2809_v40  ;;  %v586_v40 = vcvt.s32.f32 %v581_v38 }
 0x2ac   :  { %v473_v57 = vpack.c.bf16 %v2811_v51, %v2810_v52  ;;  %v3310_v52 = vsub.f32 %v586_v40, %v584_v39 }
 0x2ad   :  { %v2814_v41 = vpop.permute.xlu1 %2813 }
 0x2ae   :  { %v2816_v42 = vunpack.i.h.bf16 %v2814_v41  ;;  %v2815_v43 = vunpack.i.l.bf16 %v2814_v41  ;;  %v734_v8 = vsel %vm665_vm0, %v473_v57, 0  ;;  %v579_v41 = vadd.s32 24, %v3304_v36 }
 0x2b0   :  { %v521_v44 = vpack.c.bf16 %v2816_v42, %v2815_v43  ;;  %v582_v42 = vcvt.s32.f32 %v3304_v36  ;;  %v577_v43 = vadd.s32 8, %v3304_v36  ;;  %vm608_vm7 = vcmp.le.s32.totalorder %v581_v38, %v579_v41 }
 0x2b1   :  { %v2819_v45 = vpop.permute.xlu1 %2818  ;;  %v2804_v46 = vpop.permute.xlu0 %2803 }
 0x2b2   :  { %v2821_v47 = vunpack.i.h.bf16 %v2819_v45  ;;  %v2820_v48 = vunpack.i.l.bf16 %v2819_v45  ;;  %v2806_v49 = vunpack.i.h.bf16 %v2804_v46  ;;  %v2805_v50 = vunpack.i.l.bf16 %v2804_v46  ;;  %2677 = vmatprep.mubr.msk.bf16.mxu1 %vm665_vm0, %v521_v44 }
 0x2b3   :  { %v593_v44 = vmul.f32 0.0625, %v584_v39  ;;  %v599_v45 = vmul.f32 0.0625, %v586_v40  ;;  %v585_v46 = vcvt.s32.f32 %v579_v41  ;;  %vm606_vm10 = vcmp.le.s32.totalorder %v581_v38, %v577_v43 }
 0x2b4   :  { %v476_v53 = vpack.c.bf16 %v2821_v47, %v2820_v48  ;;  %v474_v54 = vpack.c.bf16 %v2806_v49, %v2805_v50  ;;  %v591_v47 = vmul.f32 0.0625, %v582_v42  ;;  %v583_v48 = vcvt.s32.f32 %v577_v43 }
 0x2b5   :  { %v2824_v55 = vpop.permute.xlu0 %2823  ;;  %v2829_v56 = vpop.permute.xlu1 %2828  ;;  %v597_v49 = vfloor.f32 %v593_v44  ;;  %v600_v50 = vfloor.f32 %v599_v45  ;;  %v594_v51 = vmul.f32 0.0625, %v585_v46 }
 0x2b6   :  { %2771 = vmatprep.subr.msk.bf16.mxu1 %vm665_vm0, %v474_v54  ;;  %2773 = vmatprep.subr.msk.bf16.mxu0 %vm665_vm0, %v476_v53  ;;  %v737_v58 = vsel %vm665_vm0, %v474_v54, 0  ;;  %v798_v59 = vsel %vm665_vm0, %v476_v53, 0  ;;  %v2826_v0 = vunpack.i.h.bf16 %v2824_v55  ;;  %v2825_v1 = vunpack.i.l.bf16 %v2824_v55 }
 0x2b7   :  { %2674 = vmatpush3.bf16.xpose.msra.mxu1 %v737_v58  ;;  %2682 = vmatpush3.bf16.xpose.msra.mxu0 %v798_v59  ;;  %v2831_v12 = vunpack.i.h.bf16 %v2829_v56  ;;  %v2830_v13 = vunpack.i.l.bf16 %v2829_v56  ;;  %v595_v53 = vfloor.f32 %v591_v47  ;;  %v592_v54 = vmul.f32 0.0625, %v583_v48 }
 0x2b8   :  { %2772 = vmatprep.subr.msk.bf16.mxu1 %vm665_vm0, %v473_v57  ;;  %v478_v6 = vpack.c.bf16 %v2826_v0, %v2825_v1  ;;  %vm603_vm1 = vcmp.eq.f32.partialorder %v597_v49, %v600_v50  ;;  %v3312_v55 = vsub.f32 %v586_v40, %v582_v42  ;;  %v598_v56 = vfloor.f32 %v594_v51 }
 0x2b9   :  { %v2834_v60 = vpop.permute.xlu0 %2833  ;;  %v2839_v61 = vpop.permute.xlu1 %2838  ;;  %v522_v24 = vpack.c.bf16 %v2831_v12, %v2830_v13  ;;  %v635_v57 = vmul.f32 0.25, %v3310_v52  ;;  %vm601_vm3 = vcmp.eq.f32.partialorder %v595_v53, %v600_v50  ;;  %v3316_v58 = vsub.f32 %v586_v40, %v585_v46  ;;  %vm3318_vm5 = vmand %vm603_vm1, %vm607_vm2 }
 0x2ba   :  { %v2836_v62 = vunpack.i.h.bf16 %v2834_v60  ;;  %v2835_v63 = vunpack.i.l.bf16 %v2834_v60  ;;  %v2841_v19 = vunpack.i.h.bf16 %v2839_v61  ;;  %v2840_v21 = vunpack.i.l.bf16 %v2839_v61  ;;  %vm3325_vm8 = vmand %vm601_vm3, %vm605_vm4 }
 0x2bb   :  { %v859_v29 = vsel %vm665_vm0, %v478_v6, 0  ;;  %v596_v59 = vfloor.f32 %v592_v54  ;;  %v633_v61 = vmul.f32 0.25, %v3312_v55  ;;  %vm604_vm6 = vcmp.eq.f32.partialorder %v598_v56, %v600_v50 }
 0x2bc   :  { %v475_v2 = vpack.c.bf16 %v2836_v62, %v2835_v63  ;;  %v477_v26 = vpack.c.bf16 %v2841_v19, %v2840_v21  ;;  %v3323_v62 = vsub.f32 %v586_v40, %v583_v48  ;;  %v651_v0 = vsel %vm3318_vm5, %v635_v57, -1e+30  ;;  %vm3332_vm11 = vmand %vm604_vm6, %vm608_vm7 }
 0x2bd   :  { %v2844_v3 = vpop.permute.xlu0 %2843  ;;  %v2849_v7 = vpop.permute.xlu1 %2848  ;;  %v636_v1 = vmul.f32 0.25, %v3316_v58  ;;  %vm602_vm9 = vcmp.eq.f32.partialorder %v596_v59, %v600_v50  ;;  %v641_v43 = vmul.f32 0.015625, %v3312_v55  ;;  %v640_v57 = vmul.f32 0.0625, %v3316_v58 }
 0x2be   :  { %v2846_v4 = vunpack.i.h.bf16 %v2844_v3  ;;  %v2845_v5 = vunpack.i.l.bf16 %v2844_v3  ;;  %2774 = vmatprep.subr.msk.bf16.mxu0 %vm665_vm0, %v475_v2  ;;  %v795_v9 = vsel %vm665_vm0, %v475_v2, 0  ;;  %v2851_v15 = vunpack.i.h.bf16 %v2849_v7  ;;  %vm3341_vm12 = vmand %vm602_vm9, %vm606_vm10 }
 0x2bf   :  { %2676 = vmatpush3.bf16.xpose.msra.mxu1 %v734_v8  ;;  %2684 = vmatpush3.bf16.xpose.msra.mxu0 %v795_v9  ;;  %v2850_v11 = vunpack.i.l.bf16 %v2849_v7  ;;  %v856_v31 = vsel %vm665_vm0, %v477_v26, 0  ;;  %v652_v9 = vsel %vm3332_vm11, %v636_v1, -1e+30  ;;  %v642_v47 = vmul.f32 0.015625, %v3323_v62 }
 0x2c0   :  { %v523_v10 = vpack.c.bf16 %v2846_v4, %v2845_v5  ;;  %2775 = vmatprep.subr.msk.bf16.mxu1 %vm665_vm0, %v478_v6  ;;  %v649_v4 = vsel %vm3325_vm8, %v633_v61, -1e+30  ;;  %v634_v5 = vmul.f32 0.25, %v3323_v62  ;;  %v657_v56 = vsel %vm3325_vm8, %v641_v43, -1e+30 }
 0x2c1   :  { %v2854_v14 = vpop.permute.xlu0 %2853  ;;  %v525_v25 = vpack.c.bf16 %v2851_v15, %v2850_v11  ;;  %v2859_v30 = vpop.permute.xlu1 %2858  ;;  %v658_v59 = vsel %vm3341_vm12, %v642_v47, -1e+30 }
 0x2c2   :  { %v2856_v17 = vunpack.i.h.bf16 %v2854_v14  ;;  %v2855_v18 = vunpack.i.l.bf16 %v2854_v14  ;;  %2685 = vmatprep.mubr.msk.bf16.mxu0 %vm665_vm0, %v523_v10  ;;  %v2861_v32 = vunpack.i.h.bf16 %v2859_v30  ;;  %v2860_v33 = vunpack.i.l.bf16 %v2859_v30 }
 0x2c3   :  { %v650_v14 = vsel %vm3341_vm12, %v634_v5, -1e+30  ;;  %v656_v5 = vsel %vm3332_vm11, %v640_v57, -1e+30 }
 0x2c4   :  { %v524_v22 = vpack.c.bf16 %v2856_v17, %v2855_v18  ;;  %v526_v34 = vpack.c.bf16 %v2861_v32, %v2860_v33  ;;  %v637_v33 = vmul.f32 0.0625, %v3312_v55 }
 0x2c6   :  { %2678 = vmatmul.mubr.msk.bf16.vlgmr.msra.gmra.mxu1 %vm665_vm0, %v522_v24  ;;  %2686 = vmatmul.mubr.msk.bf16.vlgmr.msra.gmra.mxu0 %vm665_vm0, %v524_v22  ;;  %v639_v22 = vmul.f32 0.0625, %v3310_v52  ;;  %v643_v24 = vmul.f32 0.015625, %v3310_v52  ;;  %v653_v42 = vsel %vm3325_vm8, %v637_v33, -1e+30 }
 0x2c7   :  { %2690 = vmatpush3.bf16.xpose.msra.mxu1 %v859_v29  ;;  %2693 = vmatprep.mubr.msk.bf16.mxu1 %vm665_vm0, %v525_v25  ;;  %v3365_v25 = vpop.f32.mrf.mxu1  ;;  %v644_v29 = vmul.f32 0.015625, %v3316_v58 }
 0x2c8   :  { %2776 = vmatprep.subr.msk.bf16.mxu1 %vm665_vm0, %v477_v26  ;;  %v655_v26 = vsel %vm3318_vm5, %v639_v22, -1e+30  ;;  %v2877_v60 = vpack.i.bf16 %v3365_v25, %v3258_v20  ;;  %v648_v22 = vmul.f32 0.00390625, %v3316_v58 }
 0x2c9   :  { %v660_v39 = vsel %vm3332_vm11, %v644_v29, -1e+30 }
 0x2cf   :  { %2692 = vmatpush3.bf16.xpose.msra.mxu1 %v856_v31  ;;  %v659_v31 = vsel %vm3318_vm5, %v643_v24, -1e+30  ;;  %v645_v24 = vmul.f32 0.00390625, %v3312_v55 }
 0x2d6   :  { %2694 = vmatmul.mubr.msk.bf16.vlgmr.msra.gmra.mxu1 %vm665_vm0, %v526_v34  ;;  %v638_v34 = vmul.f32 0.0625, %v3323_v62 }
 0x2d8   :  { %v654_v46 = vsel %vm3341_vm12, %v638_v34, -1e+30 }
 0x310   :  { %v2671_v3 = vpop.f32.mrf.mxu0 }
 0x311   :  { %v3339_v6 = vadd.f32 %v2671_v3, %v651_v0 }
 0x312   :  { %v712_v8 = vpop.f32.mrf.mxu0 }
 0x313   :  { %v3347_v10 = vadd.f32 %v712_v8, %v649_v4  ;;  %v916_v12 = vsel %vm665_vm0, %v3339_v6, -inf  ;;  %v647_v8 = vmul.f32 0.00390625, %v3310_v52 }
 0x314   :  { %917 = vmax.xlane.f32.xlu0 %v916_v12  ;;  %v2672_v13 = vpop.f32.mrf.mxu0 }
 0x315   :  { %v3353_v15 = vadd.f32 %v2672_v13, %v652_v9  ;;  %v910_v19 = vsel %vm665_vm0, %v3347_v10, -inf }
 0x316   :  { %v715_v11 = vpop.f32.mrf.mxu0 }
 0x317   :  { %v3355_v17 = vadd.f32 %v715_v11, %v650_v14  ;;  %v919_v18 = vsel %vm665_vm0, %v3353_v15, -inf  ;;  %v663_v14 = vsel %vm3318_vm5, %v647_v8, -1e+30 }
 0x318   :  { %920 = vmax.xlane.f32.xlu1 %v919_v18  ;;  %911 = vmax.xlane.f32.xlu0 %v910_v19 }
 0x319   :  { %v913_v21 = vsel %vm665_vm0, %v3355_v17, -inf }
 0x31c   :  { %914 = vmax.xlane.f32.xlu1 %v913_v21 }
 0x386   :  { %v2679_v30 = vpop.f32.mrf.mxu1  ;;  %v2687_v32 = vpop.f32.mrf.mxu0 }
 0x387   :  { %v3374_v35 = vadd.f32 %v2679_v30, %v655_v26  ;;  %v3378_v40 = vadd.f32 %v2687_v32, %v659_v31  ;;  %v664_v26 = vsel %vm3332_vm11, %v648_v22, -1e+30  ;;  %v646_v30 = vmul.f32 0.00390625, %v3323_v62 }
 0x388   :  { %v773_v37 = vpop.f32.mrf.mxu1  ;;  %v834_v38 = vpop.f32.mrf.mxu0  ;;  %v661_v32 = vsel %vm3325_vm8, %v645_v24, -1e+30 }
 0x389   :  { %v928_v41 = vsel %vm665_vm0, %v3374_v35, -inf  ;;  %v3390_v50 = vadd.f32 %v773_v37, %v653_v42  ;;  %v940_v54 = vsel %vm665_vm0, %v3378_v40, -inf  ;;  %v3403_v0 = vadd.f32 %v834_v38, %v657_v56 }
 0x38a   :  { %v2680_v44 = vpop.f32.mrf.mxu1  ;;  %v2688_v45 = vpop.f32.mrf.mxu0  ;;  %929 = vmax.xlane.f32.xlu0 %v928_v41  ;;  %v662_v33 = vsel %vm3341_vm12, %v646_v30, -1e+30 }
 0x38b   :  { %v3388_v48 = vadd.f32 %v2688_v45, %v660_v39  ;;  %v922_v4 = vsel %vm665_vm0, %v3390_v50, -inf  ;;  %v3414_v9 = vadd.f32 %v2680_v44, %v656_v5  ;;  %v934_v13 = vsel %vm665_vm0, %v3403_v0, -inf }
 0x38c   :  { %v776_v49 = vpop.f32.mrf.mxu1  ;;  %v837_v61 = vpop.f32.mrf.mxu0 }
 0x38d   :  { %v3392_v51 = vadd.f32 %v776_v49, %v654_v46  ;;  %v943_v53 = vsel %vm665_vm0, %v3388_v48, -inf  ;;  %v3405_v1 = vadd.f32 %v837_v61, %v658_v59  ;;  %v931_v19 = vsel %vm665_vm0, %v3414_v9, -inf }
 0x38e   :  { %944 = vmax.xlane.f32.xlu1 %v943_v53  ;;  %941 = vmax.xlane.f32.xlu0 %v940_v54 }
 0x38f   :  { %v925_v3 = vsel %vm665_vm0, %v3392_v51, -inf  ;;  %v937_v12 = vsel %vm665_vm0, %v3405_v1, -inf }
 0x392   :  { %926 = vmax.xlane.f32.xlu1 %v925_v3  ;;  %923 = vmax.xlane.f32.xlu0 %v922_v4 }
 0x396   :  { %v2695_v11 = vpop.f32.mrf.mxu1  ;;  %938 = vmax.xlane.f32.xlu1 %v937_v12  ;;  %935 = vmax.xlane.f32.xlu0 %v934_v13 }
 0x397   :  { %v3422_v18 = vadd.f32 %v2695_v11, %v663_v14 }
 0x398   :  { %v895_v21 = vpop.f32.mrf.mxu1 }
 0x399   :  { %v952_v52 = vsel %vm665_vm0, %v3422_v18, -inf  ;;  %v3445_v37 = vadd.f32 %v895_v21, %v661_v32 }
 0x39a   :  { %932 = vmax.xlane.f32.xlu0 %v931_v19  ;;  %v2696_v29 = vpop.f32.mrf.mxu1 }
 0x39b   :  { %v3439_v31 = vadd.f32 %v2696_v29, %v664_v26  ;;  %v946_v2 = vsel %vm665_vm0, %v3445_v37, -inf }
 0x39c   :  { %v898_v34 = vpop.f32.mrf.mxu1 }
 0x39d   :  { %v3447_v58 = vadd.f32 %v898_v34, %v662_v33  ;;  %v955_v55 = vsel %vm665_vm0, %v3439_v31, -inf  ;;  %v918_v63 = vpop.xlane.xlu0 %917 }
 0x39e   :  { %953 = vmax.xlane.f32.xlu0 %v952_v52  ;;  %v960_v39 = vsub.f32 %v3339_v6, %v918_v63 }
 0x39f   :  { %v949_v62 = vsel %vm665_vm0, %v3447_v58, -inf }
 0x3a0   :  { %v978_v43 = vmul.f32 1.442695, %v960_v39 }
 0x3a1   :  { %v921_v7 = vpop.xlane.xlu1 %920  ;;  %v912_v38 = vpop.xlane.xlu0 %911 }
 0x3a2   :  { %v958_v41 = vsub.f32 %v3347_v10, %v912_v38  ;;  %v961_v44 = vsub.f32 %v3353_v15, %v921_v7  ;;  %2948 = vpow2.f32 %v978_v43 }
 0x3a4   :  { %v974_v45 = vmul.f32 1.442695, %v958_v41  ;;  %v980_v47 = vmul.f32 1.442695, %v961_v44 }
 0x3a5   :  { %v915_v42 = vpop.xlane.xlu1 %914 }
 0x3a6   :  { %v959_v46 = vsub.f32 %v3355_v17, %v915_v42  ;;  %2950 = vpow2.f32 %v974_v45 }
 0x3a7   :  { %2868 = vrot.lane.b32.xlu1 %v3265_v27, %s3151_s1  ;;  %2952 = vpow2.f32 %v980_v47 }
 0x3a8   :  { %v976_v49 = vmul.f32 1.442695, %v959_v46 }
 0x3aa   :  { %2954 = vpow2.f32 %v976_v49 }
 0x3ab   :  { %2878 = vrot.lane.b32.xlu1 %v2877_v60, %s3152_s2 }
 0x3af   :  { %v3462_v53 = vpop.eup %2948 }
 0x3b0   :  { %v1012_v10 = vsel %vm665_vm0, %v3462_v53, 0.0 }
 0x3b3   :  { %v3464_v54 = vpop.eup %2950 }
 0x3b4   :  { %2863 = vrot.lane.b32.xlu0 %v2877_v60, %s3151_s1  ;;  %v3466_v6 = vpop.eup %2952  ;;  %v1006_v15 = vsel %vm665_vm0, %v3464_v54, 0.0 }
 0x3b5   :  { %v1015_v57 = vsel %vm665_vm0, %v3466_v6, 0.0 }
 0x3b7   :  { %v3472_v56 = vpop.eup %2954 }
 0x3b8   :  { %v1009_v17 = vsel %vm665_vm0, %v3472_v56, 0.0 }
 0x3cf   :  { %956 = vmax.xlane.f32.xlu1 %v955_v55 }
 0x3d3   :  { %950 = vmax.xlane.f32.xlu1 %v949_v62  ;;  %947 = vmax.xlane.f32.xlu0 %v946_v2 }
 0x3e4   :  { %2883 = vrot.lane.b32.xlu1 %v3265_v27, %s3147_s29 }
 0x3e9   :  { %2873 = vrot.lane.b32.xlu0 %v2877_v60, %s3147_s29 }
 0x408   :  { %1013 = vadd.xlane.f32.xlu0 %v1012_v10  ;;  %1007 = vadd.xlane.f32.xlu1 %v1006_v15 }
 0x40c   :  { %1010 = vadd.xlane.f32.xlu0 %v1009_v17  ;;  %1016 = vadd.xlane.f32.xlu1 %v1015_v57 }
 0x413   :  { %v930_v59 = vpop.xlane.xlu0 %929 }
 0x414   :  { %v964_v61 = vsub.f32 %v3374_v35, %v930_v59 }
 0x416   :  { %v986_v3 = vmul.f32 1.442695, %v964_v61 }
 0x417   :  { %v942_v4 = vpop.xlane.xlu0 %941  ;;  %v945_v14 = vpop.xlane.xlu1 %944 }
 0x418   :  { %2956 = vpow2.f32 %v986_v3  ;;  %v968_v5 = vsub.f32 %v3378_v40, %v942_v4  ;;  %v969_v60 = vsub.f32 %v3388_v48, %v945_v14 }
 0x41a   :  { %v994_v8 = vmul.f32 1.442695, %v968_v5  ;;  %v996_v40 = vmul.f32 1.442695, %v969_v60 }
 0x41b   :  { %v924_v12 = vpop.xlane.xlu0 %923  ;;  %v927_v35 = vpop.xlane.xlu1 %926 }
 0x41c   :  { %v962_v13 = vsub.f32 %v3390_v50, %v924_v12  ;;  %2958 = vpow2.f32 %v994_v8  ;;  %v963_v50 = vsub.f32 %v3392_v51, %v927_v35 }
 0x41e   :  { %v982_v11 = vmul.f32 1.442695, %v962_v13  ;;  %v984_v33 = vmul.f32 1.442695, %v963_v50 }
 0x41f   :  { %v936_v19 = vpop.xlane.xlu0 %935  ;;  %v939_v44 = vpop.xlane.xlu1 %938 }
 0x420   :  { %v966_v52 = vsub.f32 %v3403_v0, %v936_v19  ;;  %2960 = vpow2.f32 %v982_v11  ;;  %v967_v61 = vsub.f32 %v3405_v1, %v939_v44 }
 0x422   :  { %v990_v21 = vmul.f32 1.442695, %v966_v52  ;;  %v992_v8 = vmul.f32 1.442695, %v967_v61 }
 0x423   :  { %v933_v22 = vpop.xlane.xlu0 %932  ;;  %v2869_v45 = vpop.permute.xlu1 %2868 }
 0x424   :  { %v965_v24 = vsub.f32 %v3414_v9, %v933_v22  ;;  %2962 = vpow2.f32 %v990_v21 }
 0x425   :  { %v3484_v26 = vpop.eup %2956 }
 0x426   :  { %v988_v29 = vmul.f32 1.442695, %v965_v24  ;;  %v1024_v30 = vsel %vm665_vm0, %v3484_v26, 0.0 }
 0x427   :  { %1025 = vadd.xlane.f32.xlu0 %v1024_v30  ;;  %v954_v0 = vpop.xlane.xlu0 %953  ;;  %v3520_v46 = vpop.permute.xlu1 %2878 }
 0x428   :  { %2964 = vpow2.f32 %v988_v29  ;;  %v972_v48 = vsub.f32 %v3422_v18, %v954_v0  ;;  %v2871_v0 = vunpack.i.h.bf16 %v2869_v45  ;;  %v2880_v44 = vunpack.i.l.bf16 %v3520_v46 }
 0x429   :  { %v3490_v32 = vpop.eup %2958  ;;  %2966 = vpow2.f32 %v996_v40  ;;  %v567_v40 = vpack.c.bf16 %v3365_v25, %v3258_v20 }
 0x42a   :  { %v1002_v9 = vmul.f32 1.442695, %v972_v48  ;;  %v1036_v34 = vsel %vm665_vm0, %v3490_v32, 0.0  ;;  %v2870_v48 = vunpack.i.l.bf16 %v2869_v45 }
 0x42b   :  { %1037 = vadd.xlane.f32.xlu0 %v1036_v34  ;;  %v2864_v47 = vpop.permute.xlu0 %2863 }
 0x42c   :  { %2968 = vpow2.f32 %v1002_v9  ;;  %v2866_v22 = vunpack.i.h.bf16 %v2864_v47  ;;  %v2865_v24 = vunpack.i.l.bf16 %v2864_v47 }
 0x42d   :  { %v3494_v51 = vpop.eup %2960  ;;  %2970 = vpow2.f32 %v984_v33 }
 0x42e   :  { %v1018_v55 = vsel %vm665_vm0, %v3494_v51, 0.0  ;;  %v569_v33 = vpack.c.bf16 %v2866_v22, %v2865_v24 }
 0x42f   :  { %1019 = vadd.xlane.f32.xlu0 %v1018_v55 }
 0x431   :  { %v3498_v62 = vpop.eup %2962 }
 0x432   :  { %v1030_v18 = vsel %vm665_vm0, %v3498_v62, 0.0 }
 0x433   :  { %1031 = vadd.xlane.f32.xlu0 %v1030_v18 }
 0x435   :  { %v3502_v2 = vpop.eup %2964 }
 0x436   :  { %v1027_v63 = vsel %vm665_vm0, %v3502_v2, 0.0  ;;  %v3506_v7 = vpop.eup %2966 }
 0x437   :  { %1028 = vadd.xlane.f32.xlu1 %v1027_v63  ;;  %v1039_v39 = vsel %vm665_vm0, %v3506_v7, 0.0 }
 0x439   :  { %v3508_v38 = vpop.eup %2968 }
 0x43a   :  { %v1048_v41 = vsel %vm665_vm0, %v3508_v38, 0.0  ;;  %v3514_v42 = vpop.eup %2970 }
 0x43b   :  { %1040 = vadd.xlane.f32.xlu1 %v1039_v39  ;;  %1049 = vadd.xlane.f32.xlu0 %v1048_v41  ;;  %v1021_v43 = vsel %vm665_vm0, %v3514_v42, 0.0  ;;  %v570_v41 = vpack.c.bf16 %v2871_v0, %v2870_v48 }
 0x43f   :  { %1022 = vadd.xlane.f32.xlu1 %v1021_v43  ;;  %v2881_v43 = vunpack.i.h.bf16 %v3520_v46 }
 0x441   :  { %v573_v16 = vpack.c.bf16 %v2881_v43, %v2880_v44 }
 0x450   :  { %2888 = vrot.lane.b32.xlu1 %v3265_v27, %s3152_s2 }
 0x458   :  { %v957_v49 = vpop.xlane.xlu1 %956 }
 0x459   :  { %v973_v10 = vsub.f32 %v3439_v31, %v957_v49 }
 0x45b   :  { %v1004_v3 = vmul.f32 1.442695, %v973_v10 }
 0x45c   :  { %v951_v15 = vpop.xlane.xlu1 %950  ;;  %v948_v17 = vpop.xlane.xlu0 %947 }
 0x45d   :  { %v971_v57 = vsub.f32 %v3447_v58, %v951_v15  ;;  %v970_v59 = vsub.f32 %v3445_v37, %v948_v17 }
 0x45f   :  { %v998_v4 = vmul.f32 1.442695, %v970_v59  ;;  %v1000_v5 = vmul.f32 1.442695, %v971_v57 }
 0x460   :  { %v2884_v11 = vpop.permute.xlu1 %2883  ;;  %v2874_v19 = vpop.permute.xlu0 %2873 }
 0x461   :  { %2972 = vpow2.f32 %v998_v4  ;;  %v2876_v34 = vunpack.i.h.bf16 %v2874_v19  ;;  %v2875_v55 = vunpack.i.l.bf16 %v2874_v19  ;;  %v2886_v45 = vunpack.i.h.bf16 %v2884_v11 }
 0x462   :  { %2974 = vpow2.f32 %v1004_v3  ;;  %v2885_v47 = vunpack.i.l.bf16 %v2884_v11 }
 0x463   :  { %2976 = vpow2.f32 %v1000_v5 }
 0x464   :  { %2978 = vpow2.f32 %v992_v8  ;;  %v572_v23 = vpack.c.bf16 %v2886_v45, %v2885_v47 }
 0x46e   :  { %v3526_v27 = vpop.eup %2972 }
 0x46f   :  { %v3528_v12 = vpop.eup %2974  ;;  %v1042_v31 = vsel %vm665_vm0, %v3526_v27, 0.0 }
 0x470   :  { %v3532_v58 = vpop.eup %2976  ;;  %1043 = vadd.xlane.f32.xlu0 %v1042_v31  ;;  %v1051_v1 = vsel %vm665_vm0, %v3528_v12, 0.0 }
 0x471   :  { %v3536_v37 = vpop.eup %2978  ;;  %v1045_v13 = vsel %vm665_vm0, %v3532_v58, 0.0 }
 0x472   :  { %v1033_v14 = vsel %vm665_vm0, %v3536_v37, 0.0 }
 0x474   :  { %1052 = vadd.xlane.f32.xlu1 %v1051_v1  ;;  %1046 = vadd.xlane.f32.xlu0 %v1045_v13 }
 0x478   :  { %1034 = vadd.xlane.f32.xlu1 %v1033_v14 }
 0x491   :  { %v1008_v52 = vpop.xlane.xlu1 %1007  ;;  %v1014_v60 = vpop.xlane.xlu0 %1013 }
 0x492   :  { %2980 = vrcp.f32 %v1014_v60 }
 0x493   :  { %2982 = vrcp.f32 %v1008_v52 }
 0x495   :  { %v1017_v21 = vpop.xlane.xlu1 %1016  ;;  %v1011_v35 = vpop.xlane.xlu0 %1010 }
 0x496   :  { %2984 = vrcp.f32 %v1017_v21 }
 0x497   :  { %2986 = vrcp.f32 %v1011_v35 }
 0x49f   :  { %v2981_v50 = vpop.eup %2980 }
 0x4a0   :  { %v2983_v29 = vpop.eup %2982  ;;  %v1072_v18 = vmul.f32 %v2981_v50, %v3462_v53 }
 0x4a1   :  { %1094 = vxpose.xlu0.c.b16.start [1/2] (short) (narrow) %v567_v40, 32  ;;  %v1070_v25 = vmul.f32 %v2983_v29, %v3464_v54 }
 0x4a3   :  { %v2985_v30 = vpop.eup %2984 }
 0x4a4   :  { %v2987_v9 = vpop.eup %2986  ;;  %v1073_v63 = vmul.f32 %v2985_v30, %v3466_v6  ;;  %v571_v6 = vpack.c.bf16 %v2876_v34, %v2875_v55 }
 0x4a5   :  { %1171 = vxpose.xlu1.c.b16.start [1/2] (short) (narrow) %v569_v33, 32  ;;  %v1071_v39 = vmul.f32 %v2987_v9, %v3472_v56  ;;  %1095 = vxpose.xlu0.c.b16.end [2/2] (short) (narrow) %v568_v28, 32 }
 0x4a6   :  { %v1087_v20 = vpack.c.bf16 %v1073_v63, %v1072_v18 }
 0x4a7   :  { %v1086_v56 = vpack.c.bf16 %v1071_v39, %v1070_v25 }
 0x4a8   :  { %2777 = vmatprep.subr.msk.bf16.mxu0 %vm665_vm0, %v1087_v20  ;;  %v1120_v53 = vsel %vm665_vm0, %v1087_v20, 0 }
 0x4a9   :  { %2698 = vmatpush3.bf16.xpose.msra.mxu0 %v1120_v53  ;;  %1172 = vxpose.xlu1.c.b16.end [2/2] (short) (narrow) %v570_v41, 32  ;;  %v1117_v28 = vsel %vm665_vm0, %v1086_v56, 0 }
 0x4aa   :  { %1248 = vxpose.xlu0.c.b16.start [1/2] (short) (narrow) %v571_v6, 32  ;;  %2778 = vmatprep.subr.msk.bf16.mxu0 %vm665_vm0, %v1086_v56 }
 0x4ad   :  { %1325 = vxpose.xlu1.c.b16.start [1/2] (short) (narrow) %v573_v16, 32 }
 0x4ae   :  { %1249 = vxpose.xlu0.c.b16.end [2/2] (short) (narrow) %v572_v23, 32 }
 0x4b0   :  { %v1026_v54 = vpop.xlane.xlu0 %1025 }
 0x4b1   :  { %2700 = vmatpush3.bf16.xpose.msra.mxu0 %v1117_v28  ;;  %2988 = vrcp.f32 %v1026_v54 }
 0x4b4   :  { %v1038_v46 = vpop.xlane.xlu0 %1037 }
 0x4b8   :  { %v1020_v10 = vpop.xlane.xlu0 %1019 }
 0x4bc   :  { %v1032_v40 = vpop.xlane.xlu0 %1031 }
 0x4be   :  { %v2989_v57 = vpop.eup %2988 }
 0x4bf   :  { %v1076_v8 = vmul.f32 %v2989_v57, %v3484_v26 }
 0x4c0   :  { %v1029_v49 = vpop.xlane.xlu1 %1028 }
 0x4c1   :  { %2990 = vrcp.f32 %v1029_v49 }
 0x4c2   :  { %2992 = vrcp.f32 %v1038_v46 }
 0x4c4   :  { %v1041_v15 = vpop.xlane.xlu1 %1040 }
 0x4c5   :  { %2994 = vrcp.f32 %v1041_v15 }
 0x4c6   :  { %2996 = vrcp.f32 %v1020_v10 }
 0x4c8   :  { %v1023_v17 = vpop.xlane.xlu1 %1022 }
 0x4c9   :  { %2998 = vrcp.f32 %v1023_v17 }
 0x4cc   :  { %v2889_v59 = vpop.permute.xlu1 %2888 }
 0x4cd   :  { %v2891_v61 = vunpack.i.h.bf16 %v2889_v59  ;;  %v2890_v3 = vunpack.i.l.bf16 %v2889_v59 }
 0x4ce   :  { %v2991_v4 = vpop.eup %2990 }
 0x4cf   :  { %v574_v5 = vpack.c.bf16 %v2891_v61, %v2890_v3  ;;  %v1077_v31 = vmul.f32 %v2991_v4, %v3502_v2  ;;  %v2993_v1 = vpop.eup %2992 }
 0x4d0   :  { %v1080_v19 = vmul.f32 %v2993_v1, %v3490_v32  ;;  %v1050_v32 = vpop.xlane.xlu0 %1049 }
 0x4d1   :  { %1326 = vxpose.xlu1.c.b16.end [2/2] (short) (narrow) %v574_v5, 32  ;;  %v1089_v13 = vpack.c.bf16 %v1077_v31, %v1076_v8  ;;  %3000 = vrcp.f32 %v1050_v32 }
 0x4d2   :  { %v2995_v14 = vpop.eup %2994 }
 0x4d3   :  { %2779 = vmatprep.subr.msk.bf16.mxu1 %vm665_vm0, %v1089_v13  ;;  %v1197_v11 = vsel %vm665_vm0, %v1089_v13, 0  ;;  %v1081_v52 = vmul.f32 %v2995_v14, %v3506_v7  ;;  %v2997_v60 = vpop.eup %2996 }
 0x4d4   :  { %2706 = vmatpush3.bf16.xpose.msra.mxu1 %v1197_v11  ;;  %v1074_v26 = vmul.f32 %v2997_v60, %v3494_v51 }
 0x4d5   :  { %v1091_v21 = vpack.c.bf16 %v1081_v52, %v1080_v19 }
 0x4d6   :  { %v2999_v35 = vpop.eup %2998 }
 0x4d7   :  { %2781 = vmatprep.subr.msk.bf16.mxu0 %vm665_vm0, %v1091_v21  ;;  %v1075_v2 = vmul.f32 %v2999_v35, %v3514_v42  ;;  %v1274_v33 = vsel %vm665_vm0, %v1091_v21, 0  ;;  %v3153_v35 = vmov 1983009808  }
 0x4d9   :  { %v1088_v22 = vpack.c.bf16 %v1075_v2, %v1074_v26  ;;  %v1533_v26 = vunpack.c.l.s4 %v3153_v35  ;;  %v3154_v2 = vmov 1934713408  }
 0x4db   :  { %2780 = vmatprep.subr.msk.bf16.mxu1 %vm665_vm0, %v1088_v22  ;;  %v1194_v24 = vsel %vm665_vm0, %v1088_v22, 0  ;;  %v1565_v22 = vunpack.c.l.s4 %v3154_v2 }
 0x4dc   :  { %2708 = vmatpush3.bf16.xpose.msra.mxu1 %v1194_v24 }
 0x4de   :  { %v3001_v48 = vpop.eup %3000 }
 0x4df   :  { %v1084_v63 = vmul.f32 %v3001_v48, %v3508_v38 }
 0x4f9   :  { %v1044_v50 = vpop.xlane.xlu0 %1043 }
 0x4fa   :  { %3002 = vrcp.f32 %v1044_v50  ;;  %v1566_v50 = vunpack.c.0.s8 %v1565_v22 }
 0x4fd   :  { %v1053_v7 = vpop.xlane.xlu1 %1052  ;;  %v1047_v29 = vpop.xlane.xlu0 %1046 }
 0x4fe   :  { %3004 = vrcp.f32 %v1053_v7 }
 0x4ff   :  { %3006 = vrcp.f32 %v1047_v29 }
 0x500   :  { %3008 = vrcp.f32 %v1032_v40  ;;  %v1534_v40 = vunpack.c.0.s8 %v1533_v26 }
 0x501   :  { %v1035_v30 = vpop.xlane.xlu1 %1034 }
 0x502   :  { %3010 = vrcp.f32 %v1035_v30  ;;  %v3594_v7 = vsub.s32 %v1534_v40, %v3304_v36 }
 0x503   :  { %v1102_v51 = vpop.trf.xlu0 }
 0x504   :  { %2701 = vmatprep.mubr.msk.bf16.mxu0 %vm665_vm0, %v1102_v51 }
 0x507   :  { %v1179_v42 = vpop.trf.xlu1  ;;  %v1103_v0 = vpop.trf.xlu0 }
 0x508   :  { %2709 = vmatprep.mubr.msk.bf16.mxu1 %vm665_vm0, %v1179_v42  ;;  %2702 = vmatmul.mubr.msk.bf16.vlgmr.msra.gmra.mxu0 %vm665_vm0, %v1103_v0  ;;  %v3003_v9 = vpop.eup %3002 }
 0x509   :  { %2714 = vmatpush3.bf16.xpose.msra.mxu0 %v1274_v33  ;;  %v1082_v44 = vmul.f32 %v3003_v9, %v3526_v27  ;;  %v3597_v33 = vsub.s32 %v1566_v50, %v3304_v36 }
 0x50b   :  { %v3005_v34 = vpop.eup %3004  ;;  %v1180_v55 = vpop.trf.xlu1 }
 0x50c   :  { %v3007_v18 = vpop.eup %3006  ;;  %v1085_v39 = vmul.f32 %v3005_v34, %v3528_v12  ;;  %2710 = vmatmul.mubr.msk.bf16.vlgmr.msra.gmra.mxu1 %vm665_vm0, %v1180_v55  ;;  %v1256_v20 = vpop.trf.xlu0 }
 0x50d   :  { %v3009_v25 = vpop.eup %3008  ;;  %v1083_v41 = vmul.f32 %v3007_v18, %v3532_v58  ;;  %2717 = vmatprep.mubr.msk.bf16.mxu0 %vm665_vm0, %v1256_v20 }
 0x50e   :  { %v1093_v43 = vpack.c.bf16 %v1085_v39, %v1084_v63  ;;  %v1078_v38 = vmul.f32 %v3009_v25, %v3498_v62 }
 0x50f   :  { %v3011_v45 = vpop.eup %3010  ;;  %v1092_v53 = vpack.c.bf16 %v1083_v41, %v1082_v44 }
 0x510   :  { %2783 = vmatprep.subr.msk.bf16.mxu1 %vm665_vm0, %v1093_v43  ;;  %v1351_v47 = vsel %vm665_vm0, %v1093_v43, 0  ;;  %v1079_v12 = vmul.f32 %v3011_v45, %v3536_v37  ;;  %v1257_v56 = vpop.trf.xlu0 }
 0x511   :  { %2722 = vmatpush3.bf16.xpose.msra.mxu1 %v1351_v47  ;;  %v1348_v27 = vsel %vm665_vm0, %v1092_v53, 0 }
 0x512   :  { %2784 = vmatprep.subr.msk.bf16.mxu1 %vm665_vm0, %v1092_v53  ;;  %v1090_v6 = vpack.c.bf16 %v1079_v12, %v1078_v38 }
 0x514   :  { %2782 = vmatprep.subr.msk.bf16.mxu0 %vm665_vm0, %v1090_v6  ;;  %v1271_v58 = vsel %vm665_vm0, %v1090_v6, 0 }
 0x515   :  { %2716 = vmatpush3.bf16.xpose.msra.mxu0 %v1271_v58 }
 0x519   :  { %2724 = vmatpush3.bf16.xpose.msra.mxu1 %v1348_v27 }
 0x51c   :  { %2718 = vmatmul.mubr.msk.bf16.vlgmr.msra.gmra.mxu0 %vm665_vm0, %v1257_v56 }
 0x52f   :  { %v1333_v16 = vpop.trf.xlu1 }
 0x530   :  { %2725 = vmatprep.mubr.msk.bf16.mxu1 %vm665_vm0, %v1333_v16 }
 0x533   :  { %v1334_v62 = vpop.trf.xlu1 }
 0x534   :  { %2726 = vmatmul.mubr.msk.bf16.vlgmr.msra.gmra.mxu1 %vm665_vm0, %v1334_v62 }
 0x5c8   :  { %v2703_v37 = vpop.f32.mrf.mxu0 }
 0x5ca   :  { %v1156_v23 = vpop.f32.mrf.mxu0 }
 0x5cb   :  { %1402 = vxpose.xlu0.b32.start [1/4] (short) (narrow) %v1156_v23, 32 }
 0x5cc   :  { %v2711_v28 = vpop.f32.mrf.mxu1  ;;  %v2704_v54 = vpop.f32.mrf.mxu0 }
 0x5ce   :  { %v1233_v46 = vpop.f32.mrf.mxu1  ;;  %v1159_v49 = vpop.f32.mrf.mxu0 }
 0x5cf   :  { %1434 = vxpose.xlu1.b32.start [1/4] (short) (narrow) %v1233_v46, 32  ;;  %1403 = vxpose.xlu0.b32.cont [2/4] (short) (narrow) %v1159_v49, 32 }
 0x5d0   :  { %v2712_v10 = vpop.f32.mrf.mxu1 }
 0x5d2   :  { %v1236_v15 = vpop.f32.mrf.mxu1 }
 0x5d3   :  { %1435 = vxpose.xlu1.b32.cont [2/4] (short) (narrow) %v1236_v15, 32  ;;  %1404 = vxpose.xlu0.b32.cont [3/4] (short) (narrow) %v2703_v37, 32 }
 0x5d7   :  { %1436 = vxpose.xlu1.b32.cont [3/4] (short) (narrow) %v2711_v28, 32  ;;  %1405 = vxpose.xlu0.b32.end [4/4] (short) (narrow) %v2704_v54, 32 }
 0x5db   :  { %1437 = vxpose.xlu1.b32.end [4/4] (short) (narrow) %v2712_v10, 32 }
 0x5dc   :  { %v2719_v17 = vpop.f32.mrf.mxu0 }
 0x5de   :  { %v1310_v57 = vpop.f32.mrf.mxu0 }
 0x5df   :  { %1466 = vxpose.xlu0.b32.start [1/4] (short) (narrow) %v1310_v57, 32 }
 0x5e0   :  { %v2720_v59 = vpop.f32.mrf.mxu0 }
 0x5e2   :  { %v1313_v61 = vpop.f32.mrf.mxu0 }
 0x5e3   :  { %1467 = vxpose.xlu0.b32.cont [2/4] (short) (narrow) %v1313_v61, 32 }
 0x5e7   :  { %1468 = vxpose.xlu0.b32.cont [3/4] (short) (narrow) %v2719_v17, 32 }
 0x5eb   :  { %1469 = vxpose.xlu0.b32.end [4/4] (short) (narrow) %v2720_v59, 32 }
 0x5f4   :  { %v2727_v3 = vpop.f32.mrf.mxu1 }
 0x5f6   :  { %v1387_v4 = vpop.f32.mrf.mxu1 }
 0x5f7   :  { %1498 = vxpose.xlu1.b32.start [1/4] (short) (narrow) %v1387_v4, 32 }
 0x5f8   :  { %v2728_v5 = vpop.f32.mrf.mxu1 }
 0x5fa   :  { %v1390_v8 = vpop.f32.mrf.mxu1 }
 0x5fb   :  { %1499 = vxpose.xlu1.b32.cont [2/4] (short) (narrow) %v1390_v8, 32 }
 0x5ff   :  { %1500 = vxpose.xlu1.b32.cont [3/4] (short) (narrow) %v2727_v3, 32 }
 0x603   :  { %1501 = vxpose.xlu1.b32.end [4/4] (short) (narrow) %v2728_v5, 32 }
 0x647   :  { %v1418_v31 = vpop.trf.xlu0 }
 0x64b   :  { %v1419_v1 = vpop.trf.xlu0  ;;  %v1450_v14 = vpop.trf.xlu1 }
 0x64f   :  { %v1420_v13 = vpop.trf.xlu0  ;;  %v1451_v19 = vpop.trf.xlu1 }
 0x653   :  { %v1421_v11 = vpop.trf.xlu0  ;;  %v3589_v60 = vpop.trf.xlu1 }
 0x657   :  { %v3591_v24 = vpop.trf.xlu1 }
 0x65b   :  { %v1482_v52 = vpop.trf.xlu0 }
 0x65c   :  { %v1530_v29 = vcombine.low %v1418_v31, %v1482_v52  ;;  %v1531_v30 = vcombine.high %v1418_v31, %v1482_v52 }
 0x65e   :  { %v1538_v55 = vrot.slane %v1530_v29, %v3594_v7  ;;  %v1545_v18 = vrot.slane %v1531_v30, %v3594_v7 }
 0x65f   :  { %v1483_v21 = vpop.trf.xlu0 }
 0x660   :  { %v1598_v9 = vcombine.low %v1419_v1, %v1483_v21  ;;  %v1599_v34 = vcombine.high %v1419_v1, %v1483_v21 }
 0x662   :  { %v1606_v38 = vrot.slane %v1598_v9, %v3594_v7  ;;  %v1613_v12 = vrot.slane %v1599_v34, %v3594_v7 }
 0x663   :  { %v1484_v32 = vpop.trf.xlu0 }
 0x664   :  { %v1666_v20 = vcombine.low %v1420_v13, %v1484_v32  ;;  %v1667_v25 = vcombine.high %v1420_v13, %v1484_v32 }
 0x666   :  { %v1674_v37 = vrot.slane %v1666_v20, %v3594_v7  ;;  %v1681_v23 = vrot.slane %v1667_v25, %v3594_v7 }
 0x667   :  { %v1485_v42 = vpop.trf.xlu0 }
 0x668   :  { %v1734_v41 = vcombine.low %v1421_v11, %v1485_v42  ;;  %v1735_v43 = vcombine.high %v1421_v11, %v1485_v42 }
 0x66a   :  { %v1742_v49 = vrot.slane %v1734_v41, %v3594_v7  ;;  %v1749_v10 = vrot.slane %v1735_v43, %v3594_v7 }
 0x673   :  { %v1514_v51 = vpop.trf.xlu1 }
 0x674   :  { %v1546_v0 = vcombine.low %v1450_v14, %v1514_v51  ;;  %v1547_v48 = vcombine.high %v1450_v14, %v1514_v51 }
 0x676   :  { %v1554_v63 = vrot.slane %v1546_v0, %v3594_v7  ;;  %v1561_v39 = vrot.slane %v1547_v48, %v3594_v7 }
 0x677   :  { %v1515_v44 = vpop.trf.xlu1 }
 0x678   :  { %v1562_v45 = vcombine.low %v1538_v55, %v1554_v63  ;;  %v1563_v47 = vcombine.high %v1538_v55, %v1554_v63  ;;  %v1578_v53 = vcombine.low %v1545_v18, %v1561_v39  ;;  %v1579_v36 = vcombine.high %v1545_v18, %v1561_v39 }
 0x679   :  { %v1614_v6 = vcombine.low %v1451_v19, %v1515_v44  ;;  %v1615_v58 = vcombine.high %v1451_v19, %v1515_v44 }
 0x67a   :  { %v1570_v27 = vrot.slane %v1562_v45, %v3597_v33  ;;  %v1577_v56 = vrot.slane %v1563_v47, %v3597_v33  ;;  %v1586_v16 = vrot.slane %v1578_v53, %v3597_v33  ;;  %v1593_v62 = vrot.slane %v1579_v36, %v3597_v33 }
 0x67b   :  { %v1622_v28 = vrot.slane %v1614_v6, %v3594_v7  ;;  %v1629_v54 = vrot.slane %v1615_v58, %v3594_v7  ;;  %v1516_v46 = vpop.trf.xlu1 }
 0x67c   :  { %v1802_v15 = vcombine.low %v1570_v27, %v1577_v56  ;;  %v2555_v17 = vcombine.high %v1570_v27, %v1577_v56  ;;  %v1818_v4 = vcombine.low %v1586_v16, %v1593_v62  ;;  %v2556_v5 = vcombine.high %v1586_v16, %v1593_v62 }
 0x67d   :  { %v1630_v57 = vcombine.low %v1606_v38, %v1622_v28  ;;  %v1631_v59 = vcombine.high %v1606_v38, %v1622_v28  ;;  %v1646_v61 = vcombine.low %v1613_v12, %v1629_v54  ;;  %v1647_v3 = vcombine.high %v1613_v12, %v1629_v54 }
 0x67e   :  { %v1682_v8 = vcombine.low %v3589_v60, %v1516_v46  ;;  %v1683_v31 = vcombine.high %v3589_v60, %v1516_v46  ;;  %v1809_v60 = vrot.slane %v1802_v15, %v3594_v7  ;;  %v1817_v40 = vrot.slane %v2555_v17, %v3594_v7 }
 0x67f   :  { %v1638_v1 = vrot.slane %v1630_v57, %v3597_v33  ;;  %v1645_v13 = vrot.slane %v1631_v59, %v3597_v33  ;;  %v1654_v14 = vrot.slane %v1646_v61, %v3597_v33  ;;  %v1661_v11 = vrot.slane %v1647_v3, %v3597_v33  ;;  %v1517_v19 = vpop.trf.xlu1 }
 0x680   :  { %v1690_v52 = vrot.slane %v1682_v8, %v3594_v7  ;;  %v1697_v21 = vrot.slane %v1683_v31, %v3594_v7  ;;  %v1750_v35 = vcombine.low %v3591_v24, %v1517_v19  ;;  %v1751_v26 = vcombine.high %v3591_v24, %v1517_v19 }
 0x681   :  { %v1870_v2 = vcombine.low %v1638_v1, %v1645_v13  ;;  %v2557_v22 = vcombine.high %v1638_v1, %v1645_v13  ;;  %v1886_v32 = vcombine.low %v1654_v14, %v1661_v11  ;;  %v2558_v50 = vcombine.high %v1654_v14, %v1661_v11 }
 0x682   :  { %v1698_v29 = vcombine.low %v1674_v37, %v1690_v52  ;;  %v1699_v30 = vcombine.high %v1674_v37, %v1690_v52  ;;  %v1758_v51 = vrot.slane %v1750_v35, %v3594_v7  ;;  %v1765_v42 = vrot.slane %v1751_v26, %v3594_v7 }
 0x683   :  { %v1825_v0 = vrot.slane %v1818_v4, %v3594_v7  ;;  %v1833_v48 = vrot.slane %v2556_v5, %v3594_v7  ;;  %v1714_v34 = vcombine.low %v1681_v23, %v1697_v21  ;;  %v1715_v55 = vcombine.high %v1681_v23, %v1697_v21 }
 0x684   :  { %v1706_v24 = vrot.slane %v1698_v29, %v3597_v33  ;;  %v1713_v9 = vrot.slane %v1699_v30, %v3597_v33  ;;  %v1766_v18 = vcombine.low %v1742_v49, %v1758_v51  ;;  %v1767_v63 = vcombine.high %v1742_v49, %v1758_v51 }
 0x685   :  { %v1782_v39 = vcombine.low %v1749_v10, %v1765_v42  ;;  %v1783_v20 = vcombine.high %v1749_v10, %v1765_v42  ;;  %v1834_v25 = vcombine.low %v1809_v60, %v1817_v40  ;;  %v1850_v41 = vcombine.low %v1825_v0, %v1833_v48 }
 0x686   :  { %v1835_v43 = vcombine.high %v1809_v60, %v1817_v40  ;;  %v1851_v44 = vcombine.high %v1825_v0, %v1833_v48  ;;  %v1774_v45 = vrot.slane %v1766_v18, %v3597_v33  ;;  %v1781_v47 = vrot.slane %v1767_v63, %v3597_v33 }
 0x687   :  { %v1790_v53 = vrot.slane %v1782_v39, %v3597_v33  ;;  %v1797_v36 = vrot.slane %v1783_v20, %v3597_v33  ;;  %v1722_v38 = vrot.slane %v1714_v34, %v3597_v33  ;;  %v1729_v12 = vrot.slane %v1715_v55, %v3597_v33 }
 0x688   :  { %v3640_v6 = vrot.slane %v1834_v25, %v3597_v33  ;;  %v3643_v58 = vrot.slane %v1850_v41, %v3597_v33  ;;  %v2006_v27 = vcombine.low %v1774_v45, %v1781_v47  ;;  %v2561_v56 = vcombine.high %v1774_v45, %v1781_v47 }
 0x689   :  { %v1849_v16 = vrot.slane %v1835_v43, %v3597_v33  ;;  %v1865_v62 = vrot.slane %v1851_v44, %v3597_v33  ;;  %v2022_v37 = vcombine.low %v1790_v53, %v1797_v36  ;;  %v1877_v28 = vrot.slane %v1870_v2, %v3594_v7 }
 0x68a   :  { %v1867_v23 = vcombine.high %v3640_v6, %v3643_v58  ;;  %v1885_v54 = vrot.slane %v2557_v22, %v3594_v7  ;;  %v2562_v46 = vcombine.high %v1790_v53, %v1797_v36  ;;  %v1893_v49 = vrot.slane %v1886_v32, %v3594_v7 }
 0x68b   :  { %v1901_v10 = vrot.slane %v2558_v50, %v3594_v7  ;;  %v1938_v15 = vcombine.low %v1706_v24, %v1713_v9  ;;  %v2559_v59 = vcombine.high %v1706_v24, %v1713_v9  ;;  %v1954_v61 = vcombine.low %v1722_v38, %v1729_v12 }
 0x68c   :  { %2078 = vrot.lane.b32.xlu0 %v1867_v23, %s3152_s2  ;;  %v1902_v17 = vcombine.low %v1877_v28, %v1885_v54  ;;  %v1903_v57 = vcombine.high %v1877_v28, %v1885_v54  ;;  %v2560_v8 = vcombine.high %v1722_v38, %v1729_v12  ;;  %v1868_v31 = vcombine.low %v1849_v16, %v1865_v62  ;;  %v3028_v23 = vld [vmem:[#allocation2] sm:$0xff] }
 0x68d   :  { %v1918_v3 = vcombine.low %v1893_v49, %v1901_v10  ;;  %v1919_v4 = vcombine.high %v1893_v49, %v1901_v10  ;;  %v1945_v5 = vrot.slane %v1938_v15, %v3594_v7  ;;  %v1953_v13 = vrot.slane %v2559_v59, %v3594_v7 }
 0x68e   :  { %v3656_v1 = vrot.slane %v1902_v17, %v3597_v33  ;;  %v1961_v14 = vrot.slane %v1954_v61, %v3594_v7  ;;  %v1969_v19 = vrot.slane %v2560_v8, %v3594_v7  ;;  %v2013_v52 = vrot.slane %v2006_v27, %v3594_v7 }
 0x68f   :  { %v3661_v11 = vrot.slane %v1918_v3, %v3597_v33  ;;  %v1971_v21 = vcombine.high %v1945_v5, %v1953_v13  ;;  %v1970_v35 = vcombine.low %v1945_v5, %v1953_v13  ;;  %v2021_v26 = vrot.slane %v2561_v56, %v3594_v7 }
 0x690   :  { %2094 = vrot.lane.b32.xlu0 %v1868_v31, %s3147_s29  ;;  %v2029_v2 = vrot.slane %v2022_v37, %v3594_v7  ;;  %v1917_v60 = vrot.slane %v1903_v57, %v3597_v33  ;;  %v1933_v40 = vrot.slane %v1919_v4, %v3597_v33  ;;  %v1987_v32 = vcombine.high %v1961_v14, %v1969_v19  ;;  %v3029_v57 = vld [vmem:[#allocation2 + $0x8] sm:$0xff] }
 0x691   :  { %v1935_v22 = vcombine.high %v3656_v1, %v3661_v11  ;;  %v1869_v50 = vcombine.high %v1849_v16, %v1865_v62  ;;  %v1985_v29 = vrot.slane %v1971_v21, %v3597_v33  ;;  %v1986_v30 = vcombine.low %v1961_v14, %v1969_v19 }
 0x692   :  { %v2037_v51 = vrot.slane %v2562_v46, %v3594_v7  ;;  %v2001_v42 = vrot.slane %v1987_v32, %v3597_v33  ;;  %v1978_v0 = vrot.slane %v1970_v35, %v3597_v33  ;;  %v2038_v48 = vcombine.low %v2013_v52, %v2021_v26  ;;  %v3031_v35 = vld [vmem:[#allocation2 + $0x18] sm:$0xff] }
 0x693   :  { %2080 = vrot.lane.b32.xlu1 %v1935_v22, %s3152_s2  ;;  %v1866_v24 = vcombine.low %v3640_v6, %v3643_v58  ;;  %v1994_v9 = vrot.slane %v1986_v30, %v3597_v33  ;;  %v1936_v55 = vcombine.low %v1917_v60, %v1933_v40  ;;  %v1934_v39 = vcombine.low %v3656_v1, %v3661_v11  ;;  %v3030_v1 = vld [vmem:[#allocation2 + $0x10] sm:$0xff] }
 0x694   :  { %2110 = vrot.lane.b32.xlu0 %v1869_v50, %s3151_s1  ;;  %v2054_v34 = vcombine.low %v2029_v2, %v2037_v51  ;;  %v2046_v18 = vrot.slane %v2038_v48, %v3597_v33  ;;  %v2004_v63 = vcombine.low %v1985_v29, %v2001_v42  ;;  %v1937_v41 = vcombine.high %v1917_v60, %v1933_v40 }
 0x695   :  { %v2002_v20 = vcombine.low %v1978_v0, %v1994_v9  ;;  %v2005_v43 = vcombine.high %v1985_v29, %v2001_v42  ;;  %v2003_v44 = vcombine.high %v1978_v0, %v1994_v9  ;;  %v2039_v45 = vcombine.high %v2013_v52, %v2021_v26 }
 0x696   :  { %v2062_v7 = vrot.slane %v2054_v34, %v3597_v33  ;;  %v2055_v47 = vcombine.high %v2029_v2, %v2037_v51 }
 0x697   :  { %2096 = vrot.lane.b32.xlu1 %v1936_v55, %s3147_s29  ;;  %v2053_v36 = vrot.slane %v2039_v45, %v3597_v33 }
 0x698   :  { %2098 = vrot.lane.b32.xlu0 %v2004_v63, %s3147_s29  ;;  %v2070_v25 = vcombine.low %v2046_v18, %v2062_v7  ;;  %v2071_v53 = vcombine.high %v2046_v18, %v2062_v7  ;;  %v2069_v38 = vrot.slane %v2055_v47, %v3597_v33  ;;  %v2924_v18 = vld [vmem:[#allocation7 + $0x38] sm:$0xff]   ;;  %v2925_v63 = vld [vmem:[#allocation7 + $0x30] sm:$0xff]   ;;  %v2926_v7 = vld [vmem:[#allocation7 + $0x28] sm:$0xff]  }
 0x699   :  { %2729 = vmatprep.subr.bf16.mxu0 %v2924_v18 }
 0x69a   :  { %v2072_v12 = vcombine.low %v2053_v36, %v2069_v38  ;;  %v2073_v6 = vcombine.high %v2053_v36, %v2069_v38  ;;  %2730 = vmatpush3.bf16.msra.mxu0 %v2924_v18 }
 0x69b   :  { %2112 = vrot.lane.b32.xlu1 %v1937_v41, %s3151_s1  ;;  %2731 = vmatprep.subr.bf16.mxu0 %v2925_v63  ;;  %v2930_v41 = vld [vmem:[#allocation7 + $0x8] sm:$0xff]  }
 0x69c   :  { %2114 = vrot.lane.b32.xlu0 %v2005_v43, %s3151_s1  ;;  %v2931_v43 = vld [vmem:[#allocation7] sm:$0xff]  }
 0x69e   :  { %2732 = vmatpush3.bf16.msra.mxu0 %v2925_v63 }
 0x69f   :  { %2082 = vrot.lane.b32.xlu1 %v2003_v44, %s3152_s2  ;;  %2733 = vmatprep.subr.bf16.mxu0 %v2926_v7 }
 0x6a2   :  { %2734 = vmatpush3.bf16.msra.mxu0 %v2926_v7 }
 0x6a3   :  { %2084 = vrot.lane.b32.xlu1 %v2071_v53, %s3152_s2 }
 0x6a7   :  { %2100 = vrot.lane.b32.xlu1 %v2072_v12, %s3147_s29 }
 0x6ab   :  { %2116 = vrot.lane.b32.xlu1 %v2073_v6, %s3151_s1 }
 0x6fe   :  { %v2079_v58 = vpop.permute.xlu0 %2078 }
 0x6ff   :  { %v2122_v56 = vsel %vm665_vm0, %v1866_v24, %v2079_v58 }
 0x702   :  { %v2095_v27 = vpop.permute.xlu0 %2094 }
 0x703   :  { %v2127_v62 = vsel %vm2126_vm13, %v2122_v56, %v2095_v27 }
 0x705   :  { %v2081_v16 = vpop.permute.xlu1 %2080 }
 0x706   :  { %v2111_v37 = vpop.permute.xlu0 %2110  ;;  %v2123_v46 = vsel %vm665_vm0, %v1934_v39, %v2081_v16  ;;  %v2927_v39 = vld [vmem:[#allocation7 + $0x20] sm:$0xff]  }
 0x707   :  { %v2132_v33 = vsel %vm2131_vm14, %v2127_v62, %v2111_v37  ;;  %2735 = vmatprep.subr.bf16.mxu0 %v2927_v39  ;;  %v2563_v62 = vld [vmem:[%s3749_s4] ss:$0 sm:$0xff] }
 0x708   :  { %v3698_v28 = vadd.f32 %v3028_v23, %v2132_v33  ;;  %2736 = vmatpush3.bf16.msra.mxu0 %v2927_v39 }
 0x709   :  { %v2097_v54 = vpop.permute.xlu1 %2096 }
 0x70a   :  { %2142 = vadd.xlane.f32.xlu0 %v3698_v28  ;;  %v2128_v49 = vsel %vm2126_vm13, %v2123_v46, %v2097_v54  ;;  %v2099_v10 = vpop.permute.xlu0 %2098 }
 0x70d   :  { %v2113_v15 = vpop.permute.xlu1 %2112 }
 0x70e   :  { %v2133_v17 = vsel %vm2131_vm14, %v2128_v49, %v2113_v15  ;;  %v2115_v4 = vpop.permute.xlu0 %2114  ;;  %v2564_v49 = vld [vmem:[%s3750_s5] ss:$0 sm:$0xff] }
 0x70f   :  { %v3704_v59 = vadd.f32 %v3029_v57, %v2133_v17 }
 0x711   :  { %2144 = vadd.xlane.f32.xlu1 %v3704_v59  ;;  %v2083_v61 = vpop.permute.xlu1 %2082 }
 0x712   :  { %v2124_v3 = vsel %vm665_vm0, %v2002_v20, %v2083_v61  ;;  %v2928_v20 = vld [vmem:[#allocation7 + $0x18] sm:$0xff]  }
 0x713   :  { %v2129_v5 = vsel %vm2126_vm13, %v2124_v3, %v2099_v10  ;;  %2737 = vmatprep.subr.bf16.mxu0 %v2928_v20 }
 0x714   :  { %v2134_v8 = vsel %vm2131_vm14, %v2129_v5, %v2115_v4  ;;  %2738 = vmatpush3.bf16.msra.mxu0 %v2928_v20 }
 0x715   :  { %v2085_v31 = vpop.permute.xlu1 %2084  ;;  %v3710_v13 = vadd.f32 %v3030_v1, %v2134_v8 }
 0x716   :  { %v2125_v11 = vsel %vm665_vm0, %v2070_v25, %v2085_v31  ;;  %v2929_v25 = vld [vmem:[#allocation7 + $0x10] sm:$0xff]  }
 0x717   :  { %2146 = vadd.xlane.f32.xlu0 %v3710_v13  ;;  %2739 = vmatprep.subr.bf16.mxu0 %v2929_v25 }
 0x718   :  { %2740 = vmatpush3.bf16.msra.mxu0 %v2929_v25 }
 0x719   :  { %v2101_v14 = vpop.permute.xlu1 %2100  ;;  %2741 = vmatprep.subr.bf16.mxu0 %v2930_v41 }
 0x71a   :  { %v2130_v19 = vsel %vm2126_vm13, %v2125_v11, %v2101_v14 }
 0x71c   :  { %2742 = vmatpush3.bf16.msra.mxu0 %v2930_v41 }
 0x71d   :  { %v2117_v52 = vpop.permute.xlu1 %2116  ;;  %2743 = vmatprep.subr.bf16.mxu0 %v2931_v43 }
 0x71e   :  { %v2135_v21 = vsel %vm2131_vm14, %v2130_v19, %v2117_v52  ;;  %v2932_v19 = vld [vmem:[#allocation8 + $0x38] sm:$0xff]   ;;  %v2933_v52 = vld [vmem:[#allocation8 + $0x30] sm:$0xff]  }
 0x71f   :  { %v3716_v26 = vadd.f32 %v3031_v35, %v2135_v21  ;;  %2749 = vmatprep.subr.bf16.mxu1 %v2932_v19  ;;  %v2934_v21 = vld [vmem:[#allocation8 + $0x28] sm:$0xff]   ;;  %v2935_v35 = vld [vmem:[#allocation8 + $0x20] sm:$0xff]  }
 0x720   :  { %2744 = vmatpush3.bf16.msra.mxu0 %v2931_v43  ;;  %2750 = vmatpush3.bf16.msra.mxu1 %v2932_v19 }
 0x721   :  { %2148 = vadd.xlane.f32.xlu0 %v3716_v26  ;;  %2751 = vmatprep.subr.bf16.mxu1 %v2933_v52 }
 0x724   :  { %2752 = vmatpush3.bf16.msra.mxu1 %v2933_v52 }
 0x725   :  { %2753 = vmatprep.subr.bf16.mxu1 %v2934_v21 }
 0x728   :  { %2754 = vmatpush3.bf16.msra.mxu1 %v2934_v21 }
 0x729   :  { %2755 = vmatprep.subr.bf16.mxu1 %v2935_v35 }
 0x72c   :  { %2756 = vmatpush3.bf16.msra.mxu1 %v2935_v35 }
 0x793   :  { %v2143_v2 = vpop.xlane.xlu0 %2142 }
 0x794   :  { %v2150_v22 = vmul.f32 0.0078125, %v2143_v2  ;;  %v2936_v2 = vld [vmem:[#allocation8 + $0x18] sm:$0xff]  }
 0x795   :  { %2757 = vmatprep.subr.bf16.mxu1 %v2936_v2 }
 0x796   :  { %v2154_v60 = vsub.f32 %v3698_v28, %v2150_v22  ;;  %2758 = vmatpush3.bf16.msra.mxu1 %v2936_v2  ;;  %v2937_v22 = vld [vmem:[#allocation8 + $0x10] sm:$0xff]  }
 0x797   :  { %2759 = vmatprep.subr.bf16.mxu1 %v2937_v22 }
 0x798   :  { %v2158_v40 = vmul.f32 %v2154_v60, %v2154_v60 }
 0x79a   :  { %v2145_v32 = vpop.xlane.xlu1 %2144  ;;  %2162 = vadd.xlane.f32.xlu0 %v2158_v40  ;;  %2760 = vmatpush3.bf16.msra.mxu1 %v2937_v22  ;;  %v2939_v40 = vld [vmem:[#allocation8] sm:$0xff]  }
 0x79b   :  { %v2151_v50 = vmul.f32 0.0078125, %v2145_v32  ;;  %v2565_v32 = vld [vmem:[%s3752_s7] ss:$0 sm:$0xff] }
 0x79d   :  { %v2155_v29 = vsub.f32 %v3704_v59, %v2151_v50 }
 0x79f   :  { %v2159_v30 = vmul.f32 %v2155_v29, %v2155_v29 }
 0x7a0   :  { %v2147_v51 = vpop.xlane.xlu0 %2146 }
 0x7a1   :  { %v2152_v42 = vmul.f32 0.0078125, %v2147_v51  ;;  %2164 = vadd.xlane.f32.xlu1 %v2159_v30 }
 0x7a3   :  { %v2156_v0 = vsub.f32 %v3710_v13, %v2152_v42 }
 0x7a5   :  { %v2160_v48 = vmul.f32 %v2156_v0, %v2156_v0 }
 0x7a7   :  { %2166 = vadd.xlane.f32.xlu0 %v2160_v48 }
 0x7aa   :  { %v2149_v24 = vpop.xlane.xlu0 %2148 }
 0x7ab   :  { %v2153_v9 = vmul.f32 0.0078125, %v2149_v24 }
 0x7ad   :  { %v2157_v34 = vsub.f32 %v3716_v26, %v2153_v9 }
 0x7af   :  { %v2161_v55 = vmul.f32 %v2157_v34, %v2157_v34 }
 0x7b1   :  { %2168 = vadd.xlane.f32.xlu1 %v2161_v55 }
 0x823   :  { %v2163_v44 = vpop.xlane.xlu0 %2162 }
 0x824   :  { %v2170_v45 = vmul.f32 0.0078125, %v2163_v44 }
 0x826   :  { %v2174_v47 = vadd.f32 1e-05, %v2170_v45 }
 0x828   :  { %3012 = vrsqrt.f32 %v2174_v47 }
 0x82a   :  { %v2165_v53 = vpop.xlane.xlu1 %2164 }
 0x82b   :  { %v2171_v36 = vmul.f32 0.0078125, %v2165_v53 }
 0x82d   :  { %v2175_v38 = vadd.f32 1e-05, %v2171_v36 }
 0x82f   :  { %3014 = vrsqrt.f32 %v2175_v38 }
 0x830   :  { %v2167_v12 = vpop.xlane.xlu0 %2166 }
 0x831   :  { %v2172_v6 = vmul.f32 0.0078125, %v2167_v12 }
 0x833   :  { %v2176_v58 = vadd.f32 1e-05, %v2172_v6 }
 0x835   :  { %v3013_v27 = vpop.eup %3012  ;;  %3016 = vrsqrt.f32 %v2176_v58 }
 0x836   :  { %v2182_v56 = vmul.f32 %v3013_v27, %v2154_v60  ;;  %v2938_v60 = vld [vmem:[#allocation8 + $0x8] sm:$0xff]  }
 0x837   :  { %2761 = vmatprep.subr.bf16.mxu1 %v2938_v60 }
 0x838   :  { %v2192_v46 = vmul.f32 %v2563_v62, %v2182_v56  ;;  %2762 = vmatpush3.bf16.msra.mxu1 %v2938_v60 }
 0x839   :  { %2763 = vmatprep.subr.bf16.mxu1 %v2939_v40 }
 0x83a   :  { %v2169_v16 = vpop.xlane.xlu1 %2168  ;;  %v2202_v15 = vadd.f32 %v2564_v49, %v2192_v46 }
 0x83b   :  { %v2173_v37 = vmul.f32 0.0078125, %v2169_v16 }
 0x83c   :  { %v3015_v33 = vpop.eup %3014  ;;  %2764 = vmatpush3.bf16.msra.mxu1 %v2939_v40 }
 0x83d   :  { %v2177_v23 = vadd.f32 1e-05, %v2173_v37  ;;  %v2183_v54 = vmul.f32 %v3015_v33, %v2155_v29 }
 0x83f   :  { %3018 = vrsqrt.f32 %v2177_v23  ;;  %v2193_v10 = vmul.f32 %v2563_v62, %v2183_v54 }
 0x841   :  { %v2203_v17 = vadd.f32 %v2564_v49, %v2193_v10 }
 0x842   :  { %v3017_v61 = vpop.eup %3016 }
 0x843   :  { %v2206_v57 = vpack.c.bf16 %v2203_v17, %v2202_v15  ;;  %v2184_v3 = vmul.f32 %v3017_v61, %v2156_v0 }
 0x845   :  { %2745 = vmatprep.mubr.bf16.mxu0 %v2206_v57  ;;  %v2194_v8 = vmul.f32 %v2563_v62, %v2184_v3 }
 0x847   :  { %v2204_v1 = vadd.f32 %v2564_v49, %v2194_v8  ;;  %v2574_v8 = vld [vmem:[%s3754_s9] ss:$0 sm:$0xff]  ;;  %s3112_s9 = scalar_lea.vmem %s2500_s3, 512 }
 0x848   :  { %p3113_p6 = scmp.ne.s32.totalorder %s2500_s3, %s3112_s9  ;;  %p3118_p8 = scmp.lt.s32.totalorder %s3112_s9, %s3112_s9 }
 0x84a   :  { %p3119_p9 = por %p3118_p8, %p3117_p7 }
 0x84c   :  { %v3019_v4 = vpop.eup %3018  ;;  %p3120_p10 = pnand %p3119_p9, %p3113_p6 }
 0x84d   :  { %v2185_v5 = vmul.f32 %v3019_v4, %v2157_v34 }
 0x84f   :  { %v2195_v31 = vmul.f32 %v2563_v62, %v2185_v5 }
 0x851   :  { %v2205_v14 = vadd.f32 %v2564_v49, %v2195_v31 }
 0x853   :  { %v2207_v11 = vpack.c.bf16 %v2205_v14, %v2204_v1 }
 0x855   :  { %2746 = vmatmul.mubr.bf16.vlgmr.msra.gmra.mxu0 %v2207_v11 }
 0x915   :  { %v2747_v50 = vpop.f32.mrf.mxu0 }
 0x916   :  { %v2322_v29 = vadd.f32 %v2747_v50, %v2565_v32 }
 0x917   :  { %v2313_v30 = vpop.f32.mrf.mxu0 }
 0x918   :  { %v2330_v51 = vmul.f32 %v2322_v29, %v2322_v29  ;;  %v2314_v42 = vadd.f32 %v2565_v32, %v2313_v30 }
 0x919   :  { %v2748_v0 = vpop.f32.mrf.mxu0 }
 0x91a   :  { %v2334_v48 = vmul.f32 %v2330_v51, %v2322_v29  ;;  %v2328_v24 = vmul.f32 %v2314_v42, %v2314_v42  ;;  %v2325_v9 = vadd.f32 %v2748_v0, %v2565_v32 }
 0x91b   :  { %v2316_v34 = vpop.f32.mrf.mxu0 }
 0x91c   :  { %v2338_v55 = vmul.f32 0.044715, %v2334_v48  ;;  %v2332_v18 = vmul.f32 %v2328_v24, %v2314_v42  ;;  %v2331_v63 = vmul.f32 %v2325_v9, %v2325_v9  ;;  %v2317_v7 = vadd.f32 %v2565_v32, %v2316_v34 }
 0x91e   :  { %v2342_v39 = vadd.f32 %v2338_v55, %v2322_v29  ;;  %v2336_v20 = vmul.f32 0.044715, %v2332_v18  ;;  %v2335_v25 = vmul.f32 %v2331_v63, %v2325_v9  ;;  %v2329_v41 = vmul.f32 %v2317_v7, %v2317_v7 }
 0x920   :  { %v2346_v43 = vmul.f32 0.7978846, %v2342_v39  ;;  %v2340_v44 = vadd.f32 %v2336_v20, %v2314_v42  ;;  %v2339_v45 = vmul.f32 0.044715, %v2335_v25  ;;  %v2333_v47 = vmul.f32 %v2329_v41, %v2317_v7 }
 0x922   :  { %v2344_v53 = vmul.f32 0.7978846, %v2340_v44  ;;  %v2343_v36 = vadd.f32 %v2339_v45, %v2325_v9  ;;  %v2337_v38 = vmul.f32 0.044715, %v2333_v47  ;;  %3020 = vtanh.f32 %v2346_v43 }
 0x924   :  { %3022 = vtanh.f32 %v2344_v53  ;;  %v2347_v12 = vmul.f32 0.7978846, %v2343_v36  ;;  %v2341_v6 = vadd.f32 %v2337_v38, %v2317_v7 }
 0x926   :  { %3024 = vtanh.f32 %v2347_v12  ;;  %v2345_v58 = vmul.f32 0.7978846, %v2341_v6 }
 0x928   :  { %3026 = vtanh.f32 %v2345_v58 }
 0x92f   :  { %v3021_v27 = vpop.eup %3020 }
 0x930   :  { %v2354_v37 = vadd.f32 1.0, %v3021_v27 }
 0x931   :  { %v3023_v56 = vpop.eup %3022 }
 0x932   :  { %v2352_v16 = vadd.f32 1.0, %v3023_v56  ;;  %v2358_v10 = vmul.f32 0.5, %v2354_v37 }
 0x933   :  { %v3025_v62 = vpop.eup %3024 }
 0x934   :  { %v2355_v33 = vadd.f32 1.0, %v3025_v62  ;;  %v2356_v49 = vmul.f32 0.5, %v2352_v16  ;;  %v2362_v3 = vmul.f32 %v2358_v10, %v2322_v29 }
 0x935   :  { %v3027_v23 = vpop.eup %3026 }
 0x936   :  { %v2359_v54 = vmul.f32 0.5, %v2355_v33  ;;  %v2353_v46 = vadd.f32 1.0, %v3027_v23  ;;  %v2360_v57 = vmul.f32 %v2356_v49, %v2314_v42 }
 0x938   :  { %v2357_v15 = vmul.f32 0.5, %v2353_v46  ;;  %v2363_v17 = vmul.f32 %v2359_v54, %v2325_v9 }
 0x93a   :  { %v2361_v61 = vmul.f32 %v2357_v15, %v2317_v7  ;;  %v2365_v5 = vpack.c.bf16 %v2363_v17, %v2362_v3 }
 0x93c   :  { %v2364_v4 = vpack.c.bf16 %v2361_v61, %v2360_v57 }
 0x93e   :  { %2765 = vmatprep.mubr.bf16.mxu1 %v2364_v4 }
 0x93f   :  { %2766 = vmatmul.mubr.bf16.vlgmr.msra.gmra.mxu1 %v2365_v5 }
 0x9ff   :  { %v2767_v31 = vpop.f32.mrf.mxu1 }
 0xa00   :  { %v2480_v1 = vadd.f32 %v2767_v31, %v2574_v8 }
 0xa01   :  { %v2471_v14 = vpop.f32.mrf.mxu1 }
 0xa02   :  { %v2488_v11 = vadd.f32 %v2480_v1, %v3710_v13  ;;  %v2472_v19 = vadd.f32 %v2574_v8, %v2471_v14 }
 0xa03   :  { %v2768_v52 = vpop.f32.mrf.mxu1 }
 0xa04   :  { %2492 = vst [vmem:[#allocation10 + $0x10] sm:$0xff] %v2488_v11  ;;  %v2486_v21 = vadd.f32 %v2472_v19, %v3698_v28  ;;  %v2483_v35 = vadd.f32 %v2768_v52, %v2574_v8 }
 0xa05   :  { %v2474_v2 = vpop.f32.mrf.mxu1 }
 0xa06   :  { %2490 = vst [vmem:[#allocation10] sm:$0xff] %v2486_v21  ;;  %v2489_v22 = vadd.f32 %v2483_v35, %v3716_v26  ;;  %v2475_v60 = vadd.f32 %v2574_v8, %v2474_v2 }
 0xa08   :  { %2493 = vst [vmem:[#allocation10 + $0x18] sm:$0xff] %v2489_v22  ;;  %v2487_v40 = vadd.f32 %v2475_v60, %v3704_v59 }
 0xa0a   :  { %2491 = vst [vmem:[#allocation10 + $0x8] sm:$0xff] %v2487_v40 }
 0xa0b   :  { %3123 = shalt.err (!%p3120_p10)
}
 0xa0c   :  { %2505 = dma.vmem_to_hbm [thread:$0]  %s2500_s3, 512, %s3755_s10, [#allocation4], %s3144_s23, %s3144_s23, %s3145_s24  }
 0xa0d   :  { %3138 = dma.done.wait [#allocation4], 512  }
 0xa0e   :  { %3139 = vsyncadd [#allocation4], 4294966784 }
 0xa0f   :  { %2509 = vsyncpa [#allocation3], 1 }
 0xa10   :  { %2510 = vsyncpa [#allocation6], 1 }
 0xa11   :  { %2511 = vsyncpa [#allocation9], 1 }
 0xa12   :  { %2512 = vsyncpa [#allocation4], 1 }

</bundles_post_ra>
